<compile_context>
chip_gen: v7x
topology: tpu7x:2x2x1
jax: 0.10.0
libtpu: 0.0.40
codegen_flags: <defaults>
</compile_context>

<pallas_src>
import math
import jax
import jax.numpy as jnp
from jax.experimental import pallas as pl
from jax.experimental.pallas import tpu as pltpu


def _layernorm(z, w, b, eps=1e-5):
    mu = jnp.mean(z, axis=-1, keepdims=True)
    var = jnp.mean((z - mu) ** 2, axis=-1, keepdims=True)   # biased var (PyTorch LN)
    return (z - mu) * jax.lax.rsqrt(var + eps) * w + b


def seffnet_kernel(x_ref, w_se1_ref, w_se2_ref, w1_ref, w2_ref, w3_ref,
                   small_ref, o_ref):
    x = x_ref[...]                                          # (TB, D)

    # --- SELayer: y = sigmoid(relu(x @ Wse1) @ Wse2); out = y * x ---
    s1 = jnp.dot(x, w_se1_ref[...], preferred_element_type=jnp.float32)
    s1 = jnp.maximum(s1, 0.0)                               # ReLU
    s2 = jnp.dot(s1, w_se2_ref[...], preferred_element_type=jnp.float32)
    gate = 1.0 / (1.0 + jnp.exp(-s2))                       # Sigmoid (EUP exp)
    xg = gate * x                                           # (TB, D)

    # --- feed-forward stack (Dropout p=0.0 -> identity) ---
    # TODO(synk): nn.Dropout is stochastic during training; implemented as
    # eval-mode identity (default dropout_rate=0.0).
    H1 = w1_ref.shape[1]
    H2 = w2_ref.shape[1]
    DO = w3_ref.shape[1]
    small = small_ref[...]                                  # (8, P) packed slab
    b1    = small[0:1, :H1]
    ln1_w = small[1:2, :H1]
    ln1_b = small[2:3, :H1]
    b2    = small[3:4, :H2]
    ln2_w = small[4:5, :H2]
    ln2_b = small[5:6, :H2]
    b3    = small[6:7, :DO]

    h = jnp.dot(xg, w1_ref[...], preferred_element_type=jnp.float32) + b1
    h = _layernorm(h, ln1_w, ln1_b)
    h = jnp.maximum(h, 0.0)

    h = jnp.dot(h, w2_ref[...], preferred_element_type=jnp.float32) + b2
    h = _layernorm(h, ln2_w, ln2_b)
    h = jnp.maximum(h, 0.0)

    o_ref[...] = jnp.dot(h, w3_ref[...], preferred_element_type=jnp.float32) + b3


def seffnet(x, params, *, tile_b=128):
    B, D = x.shape
    H1 = params["w1"].shape[1]
    H2 = params["w2"].shape[1]
    DO = params["w3"].shape[1]
    assert B % tile_b == 0, "batch must be divisible by tile_b"

    # Pack the 7 tiny per-feature vectors into one (8, P) slab (single DMA).
    P = max(H1, H2, DO)

    def pad_row(v):
        return jnp.pad(v.reshape(1, -1), ((0, 0), (0, P - v.shape[-1])))

    small = jnp.concatenate(
        [pad_row(params["b1"]), pad_row(params["ln1_w"]), pad_row(params["ln1_b"]),
         pad_row(params["b2"]), pad_row(params["ln2_w"]), pad_row(params["ln2_b"]),
         pad_row(params["b3"]), jnp.zeros((1, P), jnp.float32)],
        axis=0)                                             # (8, P)

    def full(shape):
        return pl.BlockSpec(shape, lambda i: (0, 0))

    in_specs = [
        pl.BlockSpec((tile_b, D), lambda i: (i, 0)),        # x rows
        full((D, D // 2)),                                  # Wse1
        full((D // 2, D)),                                  # Wse2
        full((D, H1)),                                      # W1
        full((H1, H2)),                                     # W2
        full((H2, DO)),                                     # W3
        full((8, P)),                                       # packed small params
    ]
    out_spec = pl.BlockSpec((tile_b, DO), lambda i: (i, 0))

    return pl.pallas_call(
        seffnet_kernel,
        out_shape=jax.ShapeDtypeStruct((B, DO), jnp.float32),
        grid_spec=pltpu.PrefetchScalarGridSpec(
            num_scalar_prefetch=0,
            grid=(B // tile_b,),
            in_specs=in_specs,
            out_specs=out_spec,
        ),
        compiler_params=pltpu.CompilerParams(
            dimension_semantics=("parallel",),
            vmem_limit_bytes=64 * 1024 * 1024,
        ),
    )(x, params["w_se1"], params["w_se2"], params["w1"], params["w2"],
      params["w3"], small)


def init_params(key, input_shape, output_shape):
    """Matches PyTorch parameter shapes / default init.
    Linear: U(-1/sqrt(fan_in), 1/sqrt(fan_in)); LayerNorm: ones/zeros.
    Weights stored pre-transposed as (in, out)."""
    D = input_shape
    H1, H2 = D // 4, D // 16

    def linear(k, fan_in, fan_out, bias=True):
        kw, kb = jax.random.split(k)
        bound = 1.0 / math.sqrt(fan_in)
        w = jax.random.uniform(kw, (fan_in, fan_out), jnp.float32, -bound, bound)
        if not bias:
            return w, None
        b = jax.random.uniform(kb, (fan_out,), jnp.float32, -bound, bound)
        return w, b

    keys = jax.random.split(key, 5)
    w_se1, _ = linear(keys[0], D, D // 2, bias=False)
    w_se2, _ = linear(keys[1], D // 2, D, bias=False)
    w1, b1 = linear(keys[2], D, H1)
    w2, b2 = linear(keys[3], H1, H2)
    w3, b3 = linear(keys[4], H2, output_shape)
    return dict(
        w_se1=w_se1, w_se2=w_se2,
        w1=w1, b1=b1, ln1_w=jnp.ones((H1,), jnp.float32), ln1_b=jnp.zeros((H1,), jnp.float32),
        w2=w2, b2=b2, ln2_w=jnp.ones((H2,), jnp.float32), ln2_b=jnp.zeros((H2,), jnp.float32),
        w3=w3, b3=b3,
    )


def reference(x, p):
    """Pure-JAX reference of SEFFNet.forward (eval mode, dropout=identity)."""
    def ln(z, w, b, eps=1e-5):
        mu = jnp.mean(z, -1, keepdims=True)
        var = jnp.mean((z - mu) ** 2, -1, keepdims=True)
        return (z - mu) / jnp.sqrt(var + eps) * w + b

    gate = jax.nn.sigmoid(jnp.maximum(x @ p["w_se1"], 0.0) @ p["w_se2"])
    xg = gate * x
    h = jnp.maximum(ln(xg @ p["w1"] + p["b1"], p["ln1_w"], p["ln1_b"]), 0.0)
    h = jnp.maximum(ln(h @ p["w2"] + p["b2"], p["ln2_w"], p["ln2_b"]), 0.0)
    return h @ p["w3"] + p["b3"]


if __name__ == "__main__":
    B, D, DOUT = 256, 64, 16          # grid = (2,) at tile_b=128 -> both v7x TCs busy
    key = jax.random.PRNGKey(0)
    kx, kp = jax.random.split(key)
    x = jax.random.normal(kx, (B, D), jnp.float32)
    params = init_params(kp, D, DOUT)

    out = seffnet(x, params, tile_b=128)
    out = jax.block_until_ready(out)

    ref = reference(x, params)
    assert out.shape == (B, DOUT)
    assert jnp.max(jnp.abs(out - ref)) < 1e-4, "mismatch vs pure-JAX reference"
    print("KERNEL_OK")
</pallas_src>

<mosaic_0001>
module attributes {stable_mosaic.version = 11 : i64} {
  func.func @seffnet_kernel(%arg0: i32, %arg1: memref<128x64xf32, #tpu.memory_space<vmem>>, %arg2: memref<64x32xf32, #tpu.memory_space<vmem>>, %arg3: memref<32x64xf32, #tpu.memory_space<vmem>>, %arg4: memref<64x16xf32, #tpu.memory_space<vmem>>, %arg5: memref<16x4xf32, #tpu.memory_space<vmem>>, %arg6: memref<4x16xf32, #tpu.memory_space<vmem>>, %arg7: memref<8x16xf32, #tpu.memory_space<vmem>>, %arg8: memref<128x16xf32, #tpu.memory_space<vmem>>) attributes {dimension_semantics = [#tpu.dimension_semantics<parallel>], iteration_bounds = array<i64: 2>, scalar_prefetch = 0 : i64, scratch_operands = 0 : i64, tpu.core_type = #tpu.core_type<tc>, window_params = [{transform_indices = @transform_0, window_bounds = array<i64: 128, 64>}, {pipeline_mode = #tpu.pipeline_mode<synchronous>, transform_indices = @transform_1, window_bounds = array<i64: 64, 32>}, {pipeline_mode = #tpu.pipeline_mode<synchronous>, transform_indices = @transform_2, window_bounds = array<i64: 32, 64>}, {pipeline_mode = #tpu.pipeline_mode<synchronous>, transform_indices = @transform_3, window_bounds = array<i64: 64, 16>}, {pipeline_mode = #tpu.pipeline_mode<synchronous>, transform_indices = @transform_4, window_bounds = array<i64: 16, 4>}, {pipeline_mode = #tpu.pipeline_mode<synchronous>, transform_indices = @transform_5, window_bounds = array<i64: 4, 16>}, {pipeline_mode = #tpu.pipeline_mode<synchronous>, transform_indices = @transform_6, window_bounds = array<i64: 8, 16>}, {transform_indices = @transform_7, window_bounds = array<i64: 128, 16>}]} {
    %c0 = arith.constant 0 : index
    %c0_0 = arith.constant 0 : index
    %0 = vector.load %arg1[%c0, %c0_0] : memref<128x64xf32, #tpu.memory_space<vmem>>, vector<128x64xf32>
    %c0_1 = arith.constant 0 : index
    %c0_2 = arith.constant 0 : index
    %1 = vector.load %arg2[%c0_1, %c0_2] : memref<64x32xf32, #tpu.memory_space<vmem>>, vector<64x32xf32>
    %cst = arith.constant dense<0.000000e+00> : vector<128x32xf32>
    %2 = tpu.matmul %0, %1, %cst {dimension_numbers = #tpu.dot_dimension_numbers<[1], [0], [0], [1], [0, 0, 1, 1], [], []>} : vector<128x64xf32>, vector<64x32xf32>, vector<128x32xf32> -> vector<128x32xf32>
    %cst_3 = arith.constant 0.000000e+00 : f32
    %3 = vector.broadcast %cst_3 : f32 to vector<128x32xf32>
    %4 = arith.maximumf %2, %3 : vector<128x32xf32>
    %c0_4 = arith.constant 0 : index
    %c0_5 = arith.constant 0 : index
    %5 = vector.load %arg3[%c0_4, %c0_5] : memref<32x64xf32, #tpu.memory_space<vmem>>, vector<32x64xf32>
    %cst_6 = arith.constant dense<0.000000e+00> : vector<128x64xf32>
    %6 = tpu.matmul %4, %5, %cst_6 {dimension_numbers = #tpu.dot_dimension_numbers<[1], [0], [0], [1], [0, 0, 1, 1], [], []>} : vector<128x32xf32>, vector<32x64xf32>, vector<128x64xf32> -> vector<128x64xf32>
    %cst_7 = arith.constant 0.000000e+00 : f32
    %7 = vector.broadcast %cst_7 : f32 to vector<128x64xf32>
    %8 = arith.subf %7, %6 : vector<128x64xf32>
    %9 = math.exp %8 : vector<128x64xf32>
    %cst_8 = arith.constant 1.000000e+00 : f32
    %10 = vector.broadcast %cst_8 : f32 to vector<128x64xf32>
    %11 = arith.addf %10, %9 : vector<128x64xf32>
    %cst_9 = arith.constant 1.000000e+00 : f32
    %12 = vector.broadcast %cst_9 : f32 to vector<128x64xf32>
    %13 = arith.divf %12, %11 : vector<128x64xf32>
    %14 = arith.mulf %13, %0 : vector<128x64xf32>
    %c0_10 = arith.constant 0 : index
    %c0_11 = arith.constant 0 : index
    %15 = vector.load %arg7[%c0_10, %c0_11] : memref<8x16xf32, #tpu.memory_space<vmem>>, vector<8x16xf32>
    %16 = vector.extract_strided_slice %15 {offsets = [0, 0], sizes = [1, 16], strides = [1, 1]} : vector<8x16xf32> to vector<1x16xf32>
    %17 = vector.extract_strided_slice %15 {offsets = [1, 0], sizes = [1, 16], strides = [1, 1]} : vector<8x16xf32> to vector<1x16xf32>
    %18 = vector.extract_strided_slice %15 {offsets = [2, 0], sizes = [1, 16], strides = [1, 1]} : vector<8x16xf32> to vector<1x16xf32>
    %19 = vector.extract_strided_slice %15 {offsets = [3, 0], sizes = [1, 4], strides = [1, 1]} : vector<8x16xf32> to vector<1x4xf32>
    %20 = vector.extract_strided_slice %15 {offsets = [4, 0], sizes = [1, 4], strides = [1, 1]} : vector<8x16xf32> to vector<1x4xf32>
    %21 = vector.extract_strided_slice %15 {offsets = [5, 0], sizes = [1, 4], strides = [1, 1]} : vector<8x16xf32> to vector<1x4xf32>
    %22 = vector.extract_strided_slice %15 {offsets = [6, 0], sizes = [1, 16], strides = [1, 1]} : vector<8x16xf32> to vector<1x16xf32>
    %c0_12 = arith.constant 0 : index
    %c0_13 = arith.constant 0 : index
    %23 = vector.load %arg4[%c0_12, %c0_13] : memref<64x16xf32, #tpu.memory_space<vmem>>, vector<64x16xf32>
    %cst_14 = arith.constant dense<0.000000e+00> : vector<128x16xf32>
    %24 = tpu.matmul %14, %23, %cst_14 {dimension_numbers = #tpu.dot_dimension_numbers<[1], [0], [0], [1], [0, 0, 1, 1], [], []>} : vector<128x64xf32>, vector<64x16xf32>, vector<128x16xf32> -> vector<128x16xf32>
    %25 = vector.broadcast %16 : vector<1x16xf32> to vector<128x16xf32>
    %26 = arith.addf %24, %25 : vector<128x16xf32>
    %cst_15 = arith.constant dense<0.000000e+00> : vector<128xf32>
    %27 = vector.multi_reduction <add>, %26, %cst_15 [1] : vector<128x16xf32> to vector<128xf32>
    %28 = vector.shape_cast %27 : vector<128xf32> to vector<128x1xf32>
    %cst_16 = arith.constant 1.600000e+01 : f32
    %29 = vector.broadcast %cst_16 : f32 to vector<128x1xf32>
    %30 = arith.divf %28, %29 : vector<128x1xf32>
    %31 = vector.broadcast %30 : vector<128x1xf32> to vector<128x16xf32>
    %32 = arith.subf %26, %31 : vector<128x16xf32>
    %33 = arith.mulf %32, %32 : vector<128x16xf32>
    %cst_17 = arith.constant dense<0.000000e+00> : vector<128xf32>
    %34 = vector.multi_reduction <add>, %33, %cst_17 [1] : vector<128x16xf32> to vector<128xf32>
    %35 = vector.shape_cast %34 : vector<128xf32> to vector<128x1xf32>
    %cst_18 = arith.constant 1.600000e+01 : f32
    %36 = vector.broadcast %cst_18 : f32 to vector<128x1xf32>
    %37 = arith.divf %35, %36 : vector<128x1xf32>
    %38 = vector.broadcast %30 : vector<128x1xf32> to vector<128x16xf32>
    %39 = arith.subf %26, %38 : vector<128x16xf32>
    %cst_19 = arith.constant 9.99999974E-6 : f32
    %40 = vector.broadcast %cst_19 : f32 to vector<128x1xf32>
    %41 = arith.addf %37, %40 : vector<128x1xf32>
    %42 = math.rsqrt %41 : vector<128x1xf32>
    %43 = vector.broadcast %42 : vector<128x1xf32> to vector<128x16xf32>
    %44 = arith.mulf %39, %43 : vector<128x16xf32>
    %45 = vector.broadcast %17 : vector<1x16xf32> to vector<128x16xf32>
    %46 = arith.mulf %44, %45 : vector<128x16xf32>
    %47 = vector.broadcast %18 : vector<1x16xf32> to vector<128x16xf32>
    %48 = arith.addf %46, %47 : vector<128x16xf32>
    %cst_20 = arith.constant 0.000000e+00 : f32
    %49 = vector.broadcast %cst_20 : f32 to vector<128x16xf32>
    %50 = arith.maximumf %48, %49 : vector<128x16xf32>
    %c0_21 = arith.constant 0 : index
    %c0_22 = arith.constant 0 : index
    %51 = vector.load %arg5[%c0_21, %c0_22] : memref<16x4xf32, #tpu.memory_space<vmem>>, vector<16x4xf32>
    %cst_23 = arith.constant dense<0.000000e+00> : vector<128x4xf32>
    %52 = tpu.matmul %50, %51, %cst_23 {dimension_numbers = #tpu.dot_dimension_numbers<[1], [0], [0], [1], [0, 0, 1, 1], [], []>} : vector<128x16xf32>, vector<16x4xf32>, vector<128x4xf32> -> vector<128x4xf32>
    %53 = vector.broadcast %19 : vector<1x4xf32> to vector<128x4xf32>
    %54 = arith.addf %52, %53 : vector<128x4xf32>
    %cst_24 = arith.constant dense<0.000000e+00> : vector<128xf32>
    %55 = vector.multi_reduction <add>, %54, %cst_24 [1] : vector<128x4xf32> to vector<128xf32>
    %56 = vector.shape_cast %55 : vector<128xf32> to vector<128x1xf32>
    %cst_25 = arith.constant 4.000000e+00 : f32
    %57 = vector.broadcast %cst_25 : f32 to vector<128x1xf32>
    %58 = arith.divf %56, %57 : vector<128x1xf32>
    %59 = vector.broadcast %58 : vector<128x1xf32> to vector<128x4xf32>
    %60 = arith.subf %54, %59 : vector<128x4xf32>
    %61 = arith.mulf %60, %60 : vector<128x4xf32>
    %cst_26 = arith.constant dense<0.000000e+00> : vector<128xf32>
    %62 = vector.multi_reduction <add>, %61, %cst_26 [1] : vector<128x4xf32> to vector<128xf32>
    %63 = vector.shape_cast %62 : vector<128xf32> to vector<128x1xf32>
    %cst_27 = arith.constant 4.000000e+00 : f32
    %64 = vector.broadcast %cst_27 : f32 to vector<128x1xf32>
    %65 = arith.divf %63, %64 : vector<128x1xf32>
    %66 = vector.broadcast %58 : vector<128x1xf32> to vector<128x4xf32>
    %67 = arith.subf %54, %66 : vector<128x4xf32>
    %cst_28 = arith.constant 9.99999974E-6 : f32
    %68 = vector.broadcast %cst_28 : f32 to vector<128x1xf32>
    %69 = arith.addf %65, %68 : vector<128x1xf32>
    %70 = math.rsqrt %69 : vector<128x1xf32>
    %71 = vector.broadcast %70 : vector<128x1xf32> to vector<128x4xf32>
    %72 = arith.mulf %67, %71 : vector<128x4xf32>
    %73 = vector.broadcast %20 : vector<1x4xf32> to vector<128x4xf32>
    %74 = arith.mulf %72, %73 : vector<128x4xf32>
    %75 = vector.broadcast %21 : vector<1x4xf32> to vector<128x4xf32>
    %76 = arith.addf %74, %75 : vector<128x4xf32>
    %cst_29 = arith.constant 0.000000e+00 : f32
    %77 = vector.broadcast %cst_29 : f32 to vector<128x4xf32>
    %78 = arith.maximumf %76, %77 : vector<128x4xf32>
    %c0_30 = arith.constant 0 : index
    %c0_31 = arith.constant 0 : index
    %79 = vector.load %arg6[%c0_30, %c0_31] : memref<4x16xf32, #tpu.memory_space<vmem>>, vector<4x16xf32>
    %cst_32 = arith.constant dense<0.000000e+00> : vector<128x16xf32>
    %80 = tpu.matmul %78, %79, %cst_32 {dimension_numbers = #tpu.dot_dimension_numbers<[1], [0], [0], [1], [0, 0, 1, 1], [], []>} : vector<128x4xf32>, vector<4x16xf32>, vector<128x16xf32> -> vector<128x16xf32>
    %81 = vector.broadcast %22 : vector<1x16xf32> to vector<128x16xf32>
    %82 = arith.addf %80, %81 : vector<128x16xf32>
    %c0_33 = arith.constant 0 : index
    %c0_34 = arith.constant 0 : index
    %83 = vector.load %arg8[%c0_33, %c0_34] : memref<128x16xf32, #tpu.memory_space<vmem>>, vector<128x16xf32>
    tpu.vector_store %arg8[%c0_33, %c0_34], %82 {strides = array<i32>} : memref<128x16xf32, #tpu.memory_space<vmem>>, vector<128x16xf32>,
    return
  }
  func.func @transform_0(%arg0: i32) -> (i32, i32) {
    %c0_i32 = arith.constant 0 : i32
    %c0_i32_0 = arith.constant 0 : i32
    return %arg0, %c0_i32 : i32, i32
  }
  func.func @transform_1(%arg0: i32) -> (i32, i32) {
    %c0_i32 = arith.constant 0 : i32
    %c0_i32_0 = arith.constant 0 : i32
    %c0_i32_1 = arith.constant 0 : i32
    return %c0_i32, %c0_i32_0 : i32, i32
  }
  func.func @transform_2(%arg0: i32) -> (i32, i32) {
    %c0_i32 = arith.constant 0 : i32
    %c0_i32_0 = arith.constant 0 : i32
    %c0_i32_1 = arith.constant 0 : i32
    return %c0_i32, %c0_i32_0 : i32, i32
  }
  func.func @transform_3(%arg0: i32) -> (i32, i32) {
    %c0_i32 = arith.constant 0 : i32
    %c0_i32_0 = arith.constant 0 : i32
    %c0_i32_1 = arith.constant 0 : i32
    return %c0_i32, %c0_i32_0 : i32, i32
  }
  func.func @transform_4(%arg0: i32) -> (i32, i32) {
    %c0_i32 = arith.constant 0 : i32
    %c0_i32_0 = arith.constant 0 : i32
    %c0_i32_1 = arith.constant 0 : i32
    return %c0_i32, %c0_i32_0 : i32, i32
  }
  func.func @transform_5(%arg0: i32) -> (i32, i32) {
    %c0_i32 = arith.constant 0 : i32
    %c0_i32_0 = arith.constant 0 : i32
    %c0_i32_1 = arith.constant 0 : i32
    return %c0_i32, %c0_i32_0 : i32, i32
  }
  func.func @transform_6(%arg0: i32) -> (i32, i32) {
    %c0_i32 = arith.constant 0 : i32
    %c0_i32_0 = arith.constant 0 : i32
    %c0_i32_1 = arith.constant 0 : i32
    return %c0_i32, %c0_i32_0 : i32, i32
  }
  func.func @transform_7(%arg0: i32) -> (i32, i32) {
    %c0_i32 = arith.constant 0 : i32
    %c0_i32_0 = arith.constant 0 : i32
    return %arg0, %c0_i32 : i32, i32
  }
}

</mosaic_0001>

<bundles_post_ra>
// kernel: tpu_custom_call.1
= control target key start
LH: loop header
LB: loop body
LE: loop exit
PB: predicated region body
PF: predicated region fallthrough
CT: control target
= control target key end

     0   :  { %12 = vsyncpa [#allocation3], 0  ;;  %s4206_s0 = inlined_call_operand.hbm [shape: f32[256,64], index: 0, kind: input, shape index: {}]   ;;  %s4207_s1 = inlined_call_operand.hbm [shape: f32[64,32], index: 1, kind: input, shape index: {}]   ;;  %s4208_s2 = inlined_call_operand.hbm [shape: f32[32,64], index: 2, kind: input, shape index: {}]   ;;  %s4209_s3 = inlined_call_operand.hbm [shape: f32[64,16], index: 3, kind: input, shape index: {}]   ;;  %s4210_s4 = inlined_call_operand.hbm [shape: f32[16,4], index: 4, kind: input, shape index: {}]   ;;  %s4211_s5 = inlined_call_operand.hbm [shape: f32[4,16], index: 5, kind: input, shape index: {}]   ;;  %s4212_s6 = inlined_call_operand.hbm [shape: f32[8,16], index: 6, kind: input, shape index: {}]   ;;  %s4213_s7 = inlined_call_operand.hbm [shape: f32[256,16], index: 7, kind: output, shape index: {}]  }
   0x1   :  { %14 = vsyncpa [#allocation3 + $0x1], 0 }
   0x2   :  { %15 = vsyncpa [#allocation6], 0 }
   0x3   :  { %16 = vsyncpa [#allocation9], 0 }
   0x4   :  { %17 = vsyncpa [#allocation12], 0 }
   0x5   :  { %18 = vsyncpa [#allocation4], 0 }
   0x6   :  { %20 = vsyncpa [#allocation4 + $0x1], 0  ;;  %s3221_s24 = smov 0   ;;  %s3223_s25 = smov 0  }
   0x7   :  { %s3225_s26 = smov 0   ;;  %s3227_s27 = smov 0  }
   0x8 LB: > { %s3169_s28 = smov [#allocation5]   ;;  %s3242_s30 = sadd.s32 4294967295, %s3167_s27   ;;  %s3167_s27 = sphi %s3227_s27, %s4241_s27   ;;  %s3163_s26 = sphi %s3225_s26, %s4240_s26   ;;  %s3159_s25 = sphi %s3223_s25, %s4239_s25   ;;  %s3155_s24 = sphi %s3221_s24, %s4238_s24  }
   0x9   : > { %s221_s29 = sshll.u32 %s3169_s28, 4  ;;  %p2226_p0 = scmp.ge.s32.totalorder %s3167_s27, 1  ;;  %s3247_s29 = int_to_ptr.vmem [resolvable:$true] %s221_s29 }
   0xa   : > { %p4214_p1 = scmp.eq.s32.totalorder %s3242_s30, 0  ;;  %p209_p2 = scmp.lt.s32.totalorder %s3167_s27, 3 }
   0xb   : > { %s3170_s9 = smov [#allocation8]   ;;  %s3171_s12 = smov [#allocation11]  }
   0xc   : > { %p3249_p3 = pnand %p2226_p0, %p209_p2  ;;  %s247_s10 = sshll.u32 %s3170_s9, 4  ;;  %s3262_s10 = int_to_ptr.vmem [resolvable:$true] %s247_s10 }
   0xd   : > { %s274_s13 = sshll.u32 %s3171_s12, 4  ;;  %s2891_s16 = scalar_lea.hbm %s4207_s1, 1024  ;;  %s3264_s13 = int_to_ptr.vmem [resolvable:$true] %s274_s13 }
   0xe   : > { %s4218_s8 = scalar_select %p3249_p3, 1, 0 }
   0xf   : > { %p2679_p5 = pneg %p3249_p3  ;;  %p2892_p7 = scmp.ne.s32.totalorder %s4207_s1, %s2891_s16 }
  0x10   : > { %p2898_p11 = scmp.lt.u32.totalorder %s2891_s16, %s4207_s1 }
  0x11   : > { %p3258_p6 = pnand %p2679_p5, %p4214_p1 }
  0x13   : > { %p3274_p8 = pneg %p3258_p6 }
  0x15   : > { %p2894_p9 = pnand %p3274_p8, %p2892_p7 }
  0x17   : > { %p2895_p10 = pneg %p2894_p9 }
  0x19   : > { %p2900_p12 = pnand %p2898_p11, %p2895_p10 }
  0x1b   : > { %2903 = shalt.err (!%p2900_p12)
}
  0x1c   : > { %s2904_s22 = scalar_lea.vmem %s3247_s29, 1024  ;;  %p2912_p5 = scmp.lt.s32.totalorder %s3247_s29, %s3247_s29 }
  0x1d   : > { %p2905_p13 = scmp.ne.s32.totalorder %s3247_s29, %s2904_s22  ;;  %p2913_p4 = scmp.lt.s32.totalorder %s2904_s22, %s2904_s22 }
  0x1f   : > { %p2907_p0 = pnand %p2905_p13, %p3274_p8  ;;  %p2914_p7 = por %p2913_p4, %p2912_p5 }
  0x21   : > { %p2908_p2 = pneg %p2907_p0 }
  0x23   : > { %p2915_p9 = pnand %p2914_p7, %p2908_p2 }
  0x25   : > { %2918 = shalt.err (!%p2915_p9)
}
  0x26   : > { %s4216_s23 = smov 128   ;;  %s3173_s28 = smov 8  }
  0x27   : > { %2682 = dma.hbm_to_vmem [thread:$0]  (!%p3258_p6), %s4207_s1, 1024, %s3247_s29, [#allocation6], %s4216_s23, %s4216_s23, %s3173_s28  }
  0x28   : > { %s2919_s16 = scalar_lea.hbm %s4209_s3, 1024 }
  0x29   : > { %p2920_p4 = scmp.ne.s32.totalorder %s4209_s3, %s2919_s16  ;;  %p2926_p12 = scmp.lt.u32.totalorder %s2919_s16, %s4209_s3 }
  0x2b   : > { %p2922_p10 = pnand %p2920_p4, %p3274_p8 }
  0x2d   : > { %p2923_p11 = pneg %p2922_p10 }
  0x2f   : > { %p2928_p13 = pnand %p2926_p12, %p2923_p11 }
  0x31   : > { %2931 = shalt.err (!%p2928_p13)
}
  0x32   : > { %s2932_s29 = scalar_lea.vmem %s3262_s10, 1024  ;;  %p2940_p7 = scmp.lt.s32.totalorder %s3262_s10, %s3262_s10 }
  0x33   : > { %p2933_p0 = scmp.ne.s32.totalorder %s3262_s10, %s2932_s29  ;;  %p2941_p9 = scmp.lt.s32.totalorder %s2932_s29, %s2932_s29 }
  0x35   : > { %p2935_p2 = pnand %p2933_p0, %p3274_p8  ;;  %p2942_p4 = por %p2941_p9, %p2940_p7 }
  0x37   : > { %p2936_p5 = pneg %p2935_p2 }
  0x39   : > { %p2943_p10 = pnand %p2942_p4, %p2936_p5 }
  0x3b   : > { %2946 = shalt.err (!%p2943_p10)
}
  0x3c   : > { %2688 = dma.hbm_to_vmem [thread:$0]  (!%p3258_p6), %s4209_s3, 1024, %s3262_s10, [#allocation9], %s4216_s23, %s4216_s23, %s3173_s28  }
  0x3d   : > { %s2947_s15 = scalar_lea.hbm %s4211_s5, 64 }
  0x3e   : > { %p2948_p11 = scmp.ne.s32.totalorder %s4211_s5, %s2947_s15  ;;  %p2954_p0 = scmp.lt.u32.totalorder %s2947_s15, %s4211_s5 }
  0x40   : > { %p2950_p12 = pnand %p2948_p11, %p3274_p8 }
  0x42   : > { %p2951_p13 = pneg %p2950_p12 }
  0x44   : > { %p2956_p2 = pnand %p2954_p0, %p2951_p13 }
  0x46   : > { %2959 = shalt.err (!%p2956_p2)
}
  0x47   : > { %s2960_s10 = scalar_lea.vmem %s3264_s13, 64  ;;  %p2968_p4 = scmp.lt.s32.totalorder %s3264_s13, %s3264_s13 }
  0x48   : > { %p2961_p5 = scmp.ne.s32.totalorder %s3264_s13, %s2960_s10  ;;  %p2969_p10 = scmp.lt.s32.totalorder %s2960_s10, %s2960_s10 }
  0x4a   : > { %p2963_p7 = pnand %p2961_p5, %p3274_p8  ;;  %p2970_p11 = por %p2969_p10, %p2968_p4 }
  0x4c   : > { %p2964_p9 = pneg %p2963_p7 }
  0x4e   : > { %p2971_p12 = pnand %p2970_p11, %p2964_p9 }
  0x50   : > { %2974 = shalt.err (!%p2971_p12)
}
  0x51   : > { %2694 = dma.hbm_to_vmem [thread:$0]  (!%p3258_p6), %s4211_s5, 64, %s3264_s13, [#allocation12]  }
  0x52   : > { %s3174_s22 = smov [#allocation7]   ;;  %s3175_s12 = smov [#allocation10]  }
  0x53   : > { %s234_s9 = sshll.u32 %s3174_s22, 4  ;;  %s260_s14 = sshll.u32 %s3175_s12, 4  ;;  %s235_s9 = int_to_ptr.vmem [resolvable:$true] %s234_s9  ;;  %s261_s14 = int_to_ptr.vmem [resolvable:$true] %s260_s14 }
  0x54   : > { %s2975_s17 = scalar_lea.hbm %s4208_s2, 512 }
  0x55   : > { %p2976_p13 = scmp.ne.s32.totalorder %s4208_s2, %s2975_s17  ;;  %p2982_p5 = scmp.lt.u32.totalorder %s2975_s17, %s4208_s2 }
  0x57   : > { %p2978_p0 = pnand %p2976_p13, %p3274_p8 }
  0x59   : > { %p2979_p2 = pneg %p2978_p0 }
  0x5b   : > { %p2984_p7 = pnand %p2982_p5, %p2979_p2 }
  0x5d   : > { %2987 = shalt.err (!%p2984_p7)
}
  0x5e   : > { %s2988_s13 = scalar_lea.vmem %s235_s9, 512  ;;  %p2996_p11 = scmp.lt.s32.totalorder %s235_s9, %s235_s9 }
  0x5f   : > { %p2989_p9 = scmp.ne.s32.totalorder %s235_s9, %s2988_s13  ;;  %p2997_p12 = scmp.lt.s32.totalorder %s2988_s13, %s2988_s13 }
  0x61   : > { %p2991_p4 = pnand %p2989_p9, %p3274_p8  ;;  %p2998_p1 = por %p2997_p12, %p2996_p11 }
  0x63   : > { %p2992_p10 = pneg %p2991_p4 }
  0x65   : > { %p2999_p3 = pnand %p2998_p1, %p2992_p10 }
  0x67   : > { %3002 = shalt.err (!%p2999_p3)
}
  0x68   : > { %2685 = dma.hbm_to_vmem [thread:$0]  (!%p3258_p6), %s4208_s2, 512, %s235_s9, [#allocation6], %s4216_s23, %s4216_s23, %s3173_s28  }
  0x69   : > { %s3003_s16 = scalar_lea.hbm %s4210_s4, 256 }
  0x6a   : > { %p3004_p1 = scmp.ne.s32.totalorder %s4210_s4, %s3003_s16  ;;  %p3010_p0 = scmp.lt.u32.totalorder %s3003_s16, %s4210_s4 }
  0x6c   : > { %p3006_p3 = pnand %p3004_p1, %p3274_p8 }
  0x6e   : > { %p3007_p13 = pneg %p3006_p3 }
  0x70   : > { %p3012_p2 = pnand %p3010_p0, %p3007_p13 }
  0x72   : > { %3015 = shalt.err (!%p3012_p2)
}
  0x73   : > { %s3016_s21 = scalar_lea.vmem %s261_s14, 256  ;;  %p3024_p4 = scmp.lt.s32.totalorder %s261_s14, %s261_s14 }
  0x74   : > { %p3017_p5 = scmp.ne.s32.totalorder %s261_s14, %s3016_s21  ;;  %p3025_p10 = scmp.lt.s32.totalorder %s3016_s21, %s3016_s21 }
  0x76   : > { %p3019_p7 = pnand %p3017_p5, %p3274_p8  ;;  %p3026_p11 = por %p3025_p10, %p3024_p4 }
  0x78   : > { %p3020_p9 = pneg %p3019_p7 }
  0x7a   : > { %p3027_p12 = pnand %p3026_p11, %p3020_p9 }
  0x7c   : > { %3030 = shalt.err (!%p3027_p12)
}
  0x7d   : > { %2691 = dma.hbm_to_vmem [thread:$0]  (!%p3258_p6), %s4210_s4, 256, %s261_s14, [#allocation9], %s4216_s23, %s4216_s23, %s3173_s28  }
  0x7e   : > { %s3176_s29 = smov [#allocation13]   ;;  %s3031_s16 = scalar_lea.hbm %s4212_s6, 128 }
  0x7f   : > { %s285_s22 = sshll.u32 %s3176_s29, 4  ;;  %p3032_p1 = scmp.ne.s32.totalorder %s4212_s6, %s3031_s16  ;;  %s286_s22 = int_to_ptr.vmem [resolvable:$true] %s285_s22 }
  0x80   : > { %p3038_p0 = scmp.lt.u32.totalorder %s3031_s16, %s4212_s6 }
  0x81   : > { %p3034_p3 = pnand %p3032_p1, %p3274_p8 }
  0x83   : > { %p3035_p13 = pneg %p3034_p3 }
  0x85   : > { %p3040_p2 = pnand %p3038_p0, %p3035_p13 }
  0x87   : > { %3043 = shalt.err (!%p3040_p2)
}
  0x88   : > { %s3044_s14 = scalar_lea.vmem %s286_s22, 128  ;;  %p3052_p4 = scmp.lt.s32.totalorder %s286_s22, %s286_s22 }
  0x89   : > { %p3045_p5 = scmp.ne.s32.totalorder %s286_s22, %s3044_s14  ;;  %p3053_p10 = scmp.lt.s32.totalorder %s3044_s14, %s3044_s14 }
  0x8b   : > { %p3047_p7 = pnand %p3045_p5, %p3274_p8  ;;  %p3054_p11 = por %p3053_p10, %p3052_p4 }
  0x8d   : > { %p3048_p9 = pneg %p3047_p7 }
  0x8f   : > { %p3055_p12 = pnand %p3054_p11, %p3048_p9 }
  0x91   : > { %3058 = shalt.err (!%p3055_p12)
}
  0x92   : > { %2697 = dma.hbm_to_vmem [thread:$0]  (!%p3258_p6), %s4212_s6, 128, %s286_s22, [#allocation12]  }
  0x93   : > { %s2225_s19 = sadd.s32 4294967294, %s3167_s27   ;;  %s3409_s11 = sadd.s32 1, %s3167_s27  }
  0x94   : > { %s30_s13 = ssub.s32 %s3167_s27, %s3409_s11  ;;  %s33_s29 = sadd.s32 1, %s3163_s26 }
  0x95   : > { %p31_p8 = scmp.eq.s32.totalorder %s30_s13, 0  ;;  %p40_p1 = scmp.ne.s32.totalorder %s3163_s26, %s3159_s25 }
  0x96   : > { %p41_p3 = scmp.eq.s32.totalorder %s3167_s27, 0  ;;  %p46_p13 = scmp.ne.s32.totalorder %s3159_s25, %s3155_s24 }
  0x97   : > { %s3420_s12 = scalar_select %p31_p8, %s3163_s26, %s33_s29  }
  0x98   : > { %p3422_p0 = por %p41_p3, %p40_p1  ;;  %p4222_p2 = scmp.eq.s32.totalorder %s3242_s30, 0 }
  0x99   : > { %p196_p5 = scmp.eq.s32.totalorder %s3242_s30, 1  ;;  %p202_p7 = scmp.eq.s32.totalorder %s2225_s19, 1 }
  0x9a   : > { %p3428_p6 = por %p4222_p2, %p46_p13  ;;  %p2712_p9 = scmp.lt.s32.totalorder %s3167_s27, 2 }
  0x9b   : > { %s296_s16 = sand.u32 1, %s3163_s26   ;;  %p3435_p4 = por %p196_p5, %p40_p1 }
  0x9c   : > { %p3439_p10 = por %p202_p7, %p46_p13  ;;  %s2234_s20 = sshll.u32 %s296_s16, 7 }
  0x9d   : > { %s4224_s17 = scalar_select %p3435_p4, 1, 0 }
  0x9e   : > { %s4225_s18 = scalar_select %p3439_p10, 1, 0 }
  0x9f   : > { %s2332_s10 = sshll.u32 %s3167_s27, 11  ;;  %s300_s19 = scalar_lea.vmem [#allocation2], %s2234_s20 }
  0xa0   : > { %s3447_s9 = scalar_lea.hbm %s4206_s0, %s2332_s10  ;;  %s307_s13 = sshll.u32 %s300_s19, 4  ;;  %s3449_s13 = int_to_ptr.vmem [resolvable:$true] %s307_s13 }
  0xa1   : > { %p3453_p11 = pnand %p2712_p9, %p3422_p0  ;;  %s3457_s23 = scalar_lea.sflag [#allocation3], %s296_s16 }
  0xa2   : > { %s3059_s14 = scalar_lea.hbm %s3447_s9, 2048  ;;  %s3064_s15 = scalar_lea.hbm %s4206_s0, 4096 }
  0xa3   : > { %p3060_p12 = scmp.ne.s32.totalorder %s3447_s9, %s3059_s14  ;;  %p3061_p8 = pneg %p3453_p11 }
  0xa4   : > { %p3065_p13 = scmp.lt.u32.totalorder %s3447_s9, %s4206_s0  ;;  %p3066_p0 = scmp.lt.u32.totalorder %s3064_s15, %s3059_s14 }
  0xa5   : > { %p3062_p1 = pnand %p3061_p8, %p3060_p12  ;;  %p3068_p5 = scmp.lt.u32.totalorder %s3059_s14, %s3447_s9 }
  0xa6   : > { %p3067_p2 = por %p3066_p0, %p3065_p13 }
  0xa7   : > { %p3063_p3 = pneg %p3062_p1 }
  0xa8   : > { %p3069_p7 = por %p3068_p5, %p3067_p2 }
  0xaa   : > { %p3070_p9 = pnand %p3069_p7, %p3063_p3 }
  0xac   : > { %3073 = shalt.err (!%p3070_p9)
}
  0xad   : > { %s3074_s16 = scalar_lea.vmem %s3449_s13, 2048  ;;  %s3177_s20 = smov [#allocation2]  }
  0xae   : > { %p3075_p12 = scmp.ne.s32.totalorder %s3449_s13, %s3074_s16  ;;  %s3079_s10 = sshll.u32 %s3177_s20, 4  ;;  %s3080_s10 = int_to_ptr.vmem [resolvable:$false] %s3079_s10 }
  0xaf   : > { %s3081_s21 = scalar_lea.vmem %s3080_s10, 4096  ;;  %p3082_p4 = scmp.lt.s32.totalorder %s3449_s13, %s3080_s10 }
  0xb0   : > { %p3077_p1 = pnand %p3075_p12, %p3061_p8  ;;  %p3083_p13 = scmp.lt.s32.totalorder %s3081_s21, %s3074_s16 }
  0xb2   : > { %p3078_p10 = pneg %p3077_p1  ;;  %p3084_p0 = por %p3083_p13, %p3082_p4 }
  0xb4   : > { %p3085_p2 = pnand %p3084_p0, %p3078_p10 }
  0xb6   : > { %3088 = shalt.err (!%p3085_p2)
}
  0xb7   : > { %s4227_s14 = smov 128   ;;  %p4228_p8 = scmp.ne.s32.totalorder %s4218_s8, 0 }
  0xb8   : > { %2701 = dma.hbm_to_vmem [thread:$0]  (!%p3453_p11), %s3447_s9, 2048, %s3449_s13, %s3457_s23, %s4227_s14, %s4227_s14, %s3173_s28  }
  0xb9   : > { %319 = sbr.rel (%p4228_p8) target bundleno = 2005 (0x7d5), region = 48  ;;  %s3491_s15 = sand.u32 (!%p4228_p8), 1, %s3159_s25  }
  0xba   : > { %s2238_s19 = sshll.u32 (!%p4228_p8), %s3491_s15, 7  ;;  %s322_s16 = scalar_lea.sflag (!%p4228_p8), [#allocation3], %s3491_s15 }
  0xbb   : > { %s3497_s29 = scalar_lea.vmem (!%p4228_p8), [#allocation2], %s2238_s19 }
  0xc0   : > { %3134 = dma.done.wait (%p3428_p6), %s322_s16, 2048  }
  0xc1   : > { %3136 = vsyncadd (%p3428_p6), %s322_s16, 4294965248  ;;  %p4229_p4 = scmp.eq.s32.totalorder %s3242_s30, 0 }
  0xc3   : > { %3138 = dma.done.wait (%p4229_p4), [#allocation6], 1536   ;;  %p4230_p10 = pmov %p4229_p4 }
  0xc4   : > { %p4231_p11 = pmov %p4229_p4 }
  0xc5   : > { %3140 = vsyncadd (%p4230_p10), [#allocation6], 4294965760 }
  0xc6   : > { %3142 = dma.done.wait (%p4231_p11), [#allocation9], 1280   ;;  %p4232_p3 = pmov %p4229_p4 }
  0xc8   : > { %3144 = vsyncadd (%p4232_p3), [#allocation9], 4294966016  ;;  %p4233_p5 = pmov %p4232_p3 }
  0xc9   : > { %p4234_p7 = pmov %p4232_p3 }
  0xca   : > { %3146 = dma.done.wait (%p4233_p5), [#allocation12], 192  }
  0xcb   : > { %3148 = vsyncadd (%p4234_p7), [#allocation12], 4294967104  ;;  %v398_v0 = vld [vmem:[#allocation5] sm:$0xff]  ;;  %v399_v1 = vld [vmem:[#allocation5 + $0x8] sm:$0xff]  ;;  %vm406_vm0 = vcmask 523264   ;;  %vm620_vm1 = vcmask 261120  }
  0xcc   : > { %v400_v2 = vld [vmem:[#allocation5 + $0x10] sm:$0xff]  ;;  %v2603_v3 = vpack.c.bf16 %v399_v1, %v398_v0  ;;  %v401_v4 = vld [vmem:[#allocation5 + $0x18] sm:$0xff]  ;;  %v402_v6 = vld [vmem:[#allocation5 + $0x20] sm:$0xff]  ;;  %vm1132_vm2 = vcmask 130048   ;;  %vm1597_vm3 = vcmask 31744   ;;  %vm1916_vm4 = vcmask 1043456  }
  0xcd   : > { %v2607_v5 = vpack.c.bf16 %v401_v4, %v400_v2  ;;  %v403_v7 = vld [vmem:[#allocation5 + $0x28] sm:$0xff]  ;;  %v3516_v8 = vld [vmem:[%s3497_s29] sm:$0xff]  ;;  %v404_v10 = vld [vmem:[#allocation5 + $0x30] sm:$0xff]  ;;  %s4121_s8 = scalar_lea.vmem [#allocation14], %s2238_s19  ;;  %s2333_s23 = sshll.u32 %s3242_s30, 11 }
  0xce   : > { %2604 = vmatprep.subr.bf16.mxu0 %v2603_v3  ;;  %2453 = vmatprep.mubr.msk.f32.mxu0 %vm406_vm0, %v3516_v8  ;;  %v2611_v9 = vpack.c.bf16 %v403_v7, %v402_v6  ;;  %v405_v11 = vld [vmem:[#allocation5 + $0x38] sm:$0xff]  ;;  %v616_v12 = vld [vmem:[#allocation7] sm:$0xff]  ;;  %v617_v13 = vld [vmem:[#allocation7 + $0x8] sm:$0xff]  ;;  %s2095_s28 = sshll.u32 %s4121_s8, 4  ;;  %s4156_s13 = scalar_lea.hbm %s4213_s7, %s2333_s23  ;;  %s4158_s28 = int_to_ptr.vmem [resolvable:$true] %s2095_s28 }
  0xcf   : > { %2606 = vmatpush3.bf16.msra.mxu0 %v2603_v3  ;;  %v618_v14 = vld [vmem:[#allocation7 + $0x10] sm:$0xff]  ;;  %v2615_v15 = vpack.c.bf16 %v405_v11, %v404_v10  ;;  %v2619_v16 = vpack.c.bf16 %v617_v13, %v616_v12  ;;  %v619_v17 = vld [vmem:[#allocation7 + $0x18] sm:$0xff]  ;;  %v3521_v19 = vld [vmem:[%s3497_s29 + $0x8] sm:$0xff]  ;;  %s2082_s30 = scalar_lea.sflag [#allocation4], %s3491_s15  ;;  %s3089_s20 = scalar_lea.vmem %s4158_s28, 2048 }
  0xd0   : > { %2608 = vmatprep.subr.bf16.mxu0 %v2607_v5  ;;  %v2623_v18 = vpack.c.bf16 %v619_v17, %v618_v14  ;;  %v3524_v20 = vld [vmem:[%s3497_s29 + $0x10] sm:$0xff]  ;;  %v3531_v21 = vld [vmem:[%s3497_s29 + $0x18] sm:$0xff]  ;;  %v3534_v22 = vld [vmem:[%s3497_s29 + $0x20] sm:$0xff]  ;;  %p3090_p6 = scmp.ne.s32.totalorder %s4158_s28, %s3089_s20  ;;  %p4235_p9 = scmp.ne.s32.totalorder %s4224_s17, 0 }
  0xd1   : > { %2647 = vmatprep.subr.bf16.mxu1 %v2619_v16  ;;  %v3541_v23 = vld [vmem:[%s3497_s29 + $0x28] sm:$0xff]  ;;  %v3544_v24 = vld [vmem:[%s3497_s29 + $0x30] sm:$0xff]  ;;  %v3551_v25 = vld [vmem:[%s3497_s29 + $0x38] sm:$0xff]  ;;  %s3178_s10 = smov [#allocation14]  }
  0xd2   : > { %2649 = vmatpush3.bf16.msra.mxu1 %v2619_v16  ;;  %v3554_v26 = vld [vmem:[%s3497_s29 + $0x40] sm:$0xff]  ;;  %v3561_v27 = vld [vmem:[%s3497_s29 + $0x48] sm:$0xff]  ;;  %v3564_v28 = vld [vmem:[%s3497_s29 + $0x50] sm:$0xff]  ;;  %p3091_p12 = pnand %p3090_p6, %p4235_p9  ;;  %s3093_s21 = sshll.u32 %s3178_s10, 4  ;;  %s3094_s21 = int_to_ptr.vmem [resolvable:$false] %s3093_s21 }
  0xd3   : > { %2610 = vmatpush3.bf16.msra.mxu0 %v2607_v5  ;;  %2648 = vmatprep.subr.bf16.mxu1 %v2623_v18  ;;  %v3571_v29 = vld [vmem:[%s3497_s29 + $0x58] sm:$0xff]  ;;  %v3574_v30 = vld [vmem:[%s3497_s29 + $0x60] sm:$0xff]  ;;  %v3581_v31 = vld [vmem:[%s3497_s29 + $0x68] sm:$0xff]  ;;  %s3095_s14 = scalar_lea.vmem %s3094_s21, 4096  ;;  %p3096_p13 = scmp.lt.s32.totalorder %s4158_s28, %s3094_s21 }
  0xd4   : > { %2612 = vmatprep.subr.bf16.mxu0 %v2611_v9  ;;  %v3584_v32 = vld [vmem:[%s3497_s29 + $0x70] sm:$0xff]  ;;  %v3591_v33 = vld [vmem:[%s3497_s29 + $0x78] sm:$0xff]  ;;  %v927_v2 = vld [vmem:[#allocation8] sm:$0xff]  ;;  %p3092_p1 = pneg %p3091_p12  ;;  %p3097_p0 = scmp.lt.s32.totalorder %s3095_s14, %s3089_s20 }
  0xd5   : > { %v928_v3 = vld [vmem:[#allocation8 + $0x8] sm:$0xff]  ;;  %v929_v5 = vld [vmem:[#allocation8 + $0x10] sm:$0xff]  ;;  %v930_v6 = vld [vmem:[#allocation8 + $0x18] sm:$0xff] }
  0xd6   : > { %2650 = vmatpush3.bf16.msra.mxu1 %v2623_v18  ;;  %v2627_v4 = vpack.c.bf16 %v928_v3, %v927_v2  ;;  %v2631_v7 = vpack.c.bf16 %v930_v6, %v929_v5  ;;  %v932_v10 = vld [vmem:[#allocation8 + $0x28] sm:$0xff]  ;;  %v933_v12 = vld [vmem:[#allocation8 + $0x30] sm:$0xff]  ;;  %v934_v13 = vld [vmem:[#allocation8 + $0x38] sm:$0xff]  ;;  %p3098_p2 = por %p3097_p0, %p3096_p13 }
  0xd7   : > { %2614 = vmatpush3.bf16.msra.mxu0 %v2611_v9  ;;  %v931_v9 = vld [vmem:[#allocation8 + $0x20] sm:$0xff]  ;;  %v2639_v14 = vpack.c.bf16 %v934_v13, %v933_v12 }
  0xd8   : > { %2616 = vmatprep.subr.bf16.mxu0 %v2615_v15  ;;  %2628 = vmatprep.subr.bf16.mxu1 %v2627_v4  ;;  %v2635_v11 = vpack.c.bf16 %v932_v10, %v931_v9  ;;  %p3099_p8 = pnand %p3098_p2, %p3092_p1 }
  0xdb   : > { %2618 = vmatpush3.bf16.msra.mxu0 %v2615_v15 }
  0xdc   : > { %2620 = vmatprep.subr.bf16.mxu0 %v2619_v16 }
  0xde   : > { %2454 = vmatmul.mubr.msk.f32.vlgmr.msra.gmra.mrb[0].mxu0 %vm406_vm0, %v3521_v19 }
  0xdf   : > { %2456 = vmatprep.mubr.msk.f32.mxu0 %vm406_vm0, %v3524_v20  ;;  %2622 = vmatpush3.bf16.msra.mxu0 %v2619_v16 }
  0xe0   : > { %2624 = vmatprep.subr.bf16.mxu0 %v2623_v18 }
  0xe2   : > { %2457 = vmatmul.mubr.msk.f32.gmra.mrb[2].mxu0 %vm406_vm0, %v3531_v21 }
  0xe3   : > { %2459 = vmatprep.mubr.msk.f32.mxu0 %vm406_vm0, %v3534_v22  ;;  %2626 = vmatpush3.bf16.msra.mxu0 %v2623_v18 }
  0xe6   : > { %2460 = vmatmul.mubr.msk.f32.gmra.mrb[4].mxu0 %vm406_vm0, %v3541_v23 }
  0xe7   : > { %2462 = vmatprep.mubr.msk.f32.mxu0 %vm406_vm0, %v3544_v24 }
  0xea   : > { %2463 = vmatmul.mubr.msk.f32.gmra.mrb[6].mxu0 %vm406_vm0, %v3551_v25 }
  0xeb   : > { %2465 = vmatprep.mubr.msk.f32.mxu0 %vm406_vm0, %v3554_v26 }
  0xee   : > { %2466 = vmatmul.mubr.msk.f32.gmra.mrb[8].mxu0 %vm406_vm0, %v3561_v27 }
  0xef   : > { %2468 = vmatprep.mubr.msk.f32.mxu0 %vm406_vm0, %v3564_v28 }
  0xf2   : > { %2469 = vmatmul.mubr.msk.f32.gmra.mrb[10].mxu0 %vm406_vm0, %v3571_v29 }
  0xf3   : > { %2471 = vmatprep.mubr.msk.f32.mxu0 %vm406_vm0, %v3574_v30 }
  0xf6   : > { %2472 = vmatmul.mubr.msk.f32.gmra.mrb[12].mxu0 %vm406_vm0, %v3581_v31 }
  0xf7   : > { %2474 = vmatprep.mubr.msk.f32.mxu0 %vm406_vm0, %v3584_v32 }
  0xfa   : > { %2475 = vmatmul.mubr.msk.f32.gmra.mrb[14].mxu0 %vm406_vm0, %v3591_v33 }
 0x1b1   : > { %v2455_v34 = vpop.f32.mrb[0].mxu0 }
 0x1b2   : > { %v521_v35 = vpop.f32.mrb[1].mxu0  ;;  %v601_v37 = vmax.f32 %v2455_v34, 0.0 }
 0x1b3   : > { %v600_v36 = vmax.f32 %v521_v35, 0.0 }
 0x1b5   : > { %v2458_v38 = vpop.f32.mrb[2].mxu0  ;;  %2485 = vmatprep.mubr.msk.f32.mxu0 %vm620_vm1, %v600_v36 }
 0x1b6   : > { %v531_v39 = vpop.f32.mrb[3].mxu0  ;;  %2486 = vmatmul.mubr.msk.f32.vlgmr.msra.gmra.mrb[16].mxu0 %vm620_vm1, %v601_v37  ;;  %v603_v41 = vmax.f32 %v2458_v38, 0.0 }
 0x1b7   : > { %v602_v40 = vmax.f32 %v531_v39, 0.0 }
 0x1b9   : > { %v2461_v42 = vpop.f32.mrb[4].mxu0  ;;  %2488 = vmatprep.mubr.msk.f32.mxu0 %vm620_vm1, %v602_v40 }
 0x1ba   : > { %v605_v43 = vmax.f32 %v2461_v42, 0.0  ;;  %v541_v44 = vpop.f32.mrb[5].mxu0  ;;  %2489 = vmatmul.mubr.msk.f32.gmra.mrb[18].mxu0 %vm620_vm1, %v603_v41 }
 0x1bb   : > { %v604_v45 = vmax.f32 %v541_v44, 0.0 }
 0x1bd   : > { %v2464_v46 = vpop.f32.mrb[6].mxu0  ;;  %2491 = vmatprep.mubr.msk.f32.mxu0 %vm620_vm1, %v604_v45 }
 0x1be   : > { %v607_v47 = vmax.f32 %v2464_v46, 0.0  ;;  %v551_v48 = vpop.f32.mrb[7].mxu0  ;;  %2492 = vmatmul.mubr.msk.f32.gmra.mrb[20].mxu0 %vm620_vm1, %v605_v43 }
 0x1bf   : > { %v606_v49 = vmax.f32 %v551_v48, 0.0 }
 0x1c1   : > { %v2467_v50 = vpop.f32.mrb[8].mxu0  ;;  %2494 = vmatprep.mubr.msk.f32.mxu1 %vm620_vm1, %v606_v49 }
 0x1c2   : > { %v609_v51 = vmax.f32 %v2467_v50, 0.0  ;;  %v561_v52 = vpop.f32.mrb[9].mxu0  ;;  %2495 = vmatmul.mubr.msk.f32.vlgmr.msra.gmra.mrb[0].mxu1 %vm620_vm1, %v607_v47 }
 0x1c3   : > { %v608_v53 = vmax.f32 %v561_v52, 0.0  ;;  %2630 = vmatpush3.bf16.msra.mxu1 %v2627_v4 }
 0x1c4   : > { %2632 = vmatprep.subr.bf16.mxu1 %v2631_v7 }
 0x1c5   : > { %v2470_v54 = vpop.f32.mrb[10].mxu0  ;;  %2497 = vmatprep.mubr.msk.f32.mxu1 %vm620_vm1, %v608_v53 }
 0x1c6   : > { %v611_v55 = vmax.f32 %v2470_v54, 0.0  ;;  %v571_v56 = vpop.f32.mrb[11].mxu0  ;;  %2498 = vmatmul.mubr.msk.f32.gmra.mrb[2].mxu1 %vm620_vm1, %v609_v51 }
 0x1c7   : > { %v610_v57 = vmax.f32 %v571_v56, 0.0  ;;  %2634 = vmatpush3.bf16.msra.mxu1 %v2631_v7 }
 0x1c8   : > { %2636 = vmatprep.subr.bf16.mxu1 %v2635_v11 }
 0x1c9   : > { %v2473_v58 = vpop.f32.mrb[12].mxu0  ;;  %2500 = vmatprep.mubr.msk.f32.mxu1 %vm620_vm1, %v610_v57 }
 0x1ca   : > { %v613_v59 = vmax.f32 %v2473_v58, 0.0  ;;  %v581_v60 = vpop.f32.mrb[13].mxu0  ;;  %2501 = vmatmul.mubr.msk.f32.gmra.mrb[4].mxu1 %vm620_vm1, %v611_v55 }
 0x1cb   : > { %v612_v61 = vmax.f32 %v581_v60, 0.0  ;;  %2638 = vmatpush3.bf16.msra.mxu1 %v2635_v11 }
 0x1cc   : > { %2640 = vmatprep.subr.bf16.mxu1 %v2639_v14 }
 0x1cd   : > { %v2476_v62 = vpop.f32.mrb[14].mxu0  ;;  %2503 = vmatprep.mubr.msk.f32.mxu1 %vm620_vm1, %v612_v61 }
 0x1ce   : > { %v615_v63 = vmax.f32 %v2476_v62, 0.0  ;;  %v591_v0 = vpop.f32.mrb[15].mxu0  ;;  %2504 = vmatmul.mubr.msk.f32.gmra.mrb[6].mxu1 %vm620_vm1, %v613_v59 }
 0x1cf   : > { %v614_v1 = vmax.f32 %v591_v0, 0.0  ;;  %2642 = vmatpush3.bf16.msra.mxu1 %v2639_v14 }
 0x1d1   : > { %2506 = vmatprep.mubr.msk.f32.mxu1 %vm620_vm1, %v614_v1 }
 0x1d2   : > { %2507 = vmatmul.mubr.msk.f32.gmra.mrb[8].mxu1 %vm620_vm1, %v615_v63 }
 0x289   : > { %v2487_v15 = vpop.f32.mrb[16].mxu0 }
 0x28a   : > { %v815_v16 = vsub.f32 0.0, %v2487_v15  ;;  %v735_v17 = vpop.f32.mrb[17].mxu0 }
 0x28b   : > { %v814_v18 = vsub.f32 0.0, %v735_v17 }
 0x28c   : > { %v832_v34 = vmul.f32 1.442695, %v815_v16 }
 0x28d   : > { %v830_v35 = vmul.f32 1.442695, %v814_v18  ;;  %v2490_v36 = vpop.f32.mrb[18].mxu0 }
 0x28e   : > { %2762 = vpow2.f32 %v832_v34  ;;  %v817_v37 = vsub.f32 0.0, %v2490_v36  ;;  %v745_v38 = vpop.f32.mrb[19].mxu0 }
 0x28f   : > { %2764 = vpow2.f32 %v830_v35  ;;  %v816_v39 = vsub.f32 0.0, %v745_v38 }
 0x290   : > { %v836_v40 = vmul.f32 1.442695, %v817_v37 }
 0x291   : > { %v834_v41 = vmul.f32 1.442695, %v816_v39  ;;  %v2493_v42 = vpop.f32.mrb[20].mxu0 }
 0x292   : > { %2766 = vpow2.f32 %v836_v40  ;;  %v819_v43 = vsub.f32 0.0, %v2493_v42  ;;  %v755_v44 = vpop.f32.mrb[21].mxu0 }
 0x293   : > { %2768 = vpow2.f32 %v834_v41  ;;  %v818_v45 = vsub.f32 0.0, %v755_v44 }
 0x294   : > { %v840_v46 = vmul.f32 1.442695, %v819_v43 }
 0x295   : > { %v838_v47 = vmul.f32 1.442695, %v818_v45  ;;  %v2496_v48 = vpop.f32.mrb[0].mxu1 }
 0x296   : > { %2770 = vpow2.f32 %v840_v46  ;;  %v821_v49 = vsub.f32 0.0, %v2496_v48  ;;  %v765_v50 = vpop.f32.mrb[1].mxu1 }
 0x297   : > { %2772 = vpow2.f32 %v838_v47  ;;  %v820_v51 = vsub.f32 0.0, %v765_v50 }
 0x298   : > { %v2763_v52 = vpop.eup %2762  ;;  %v844_v53 = vmul.f32 1.442695, %v821_v49 }
 0x299   : > { %v2765_v54 = vpop.eup %2764  ;;  %v863_v55 = vadd.f32 1.0, %v2763_v52  ;;  %v842_v56 = vmul.f32 1.442695, %v820_v51  ;;  %v2499_v57 = vpop.f32.mrb[2].mxu1 }
 0x29a   : > { %v862_v58 = vadd.f32 1.0, %v2765_v54  ;;  %2774 = vpow2.f32 %v844_v53  ;;  %v823_v59 = vsub.f32 0.0, %v2499_v57  ;;  %v775_v60 = vpop.f32.mrb[3].mxu1 }
 0x29b   : > { %2776 = vrcp.f32 %v863_v55  ;;  %v822_v61 = vsub.f32 0.0, %v775_v60 }
 0x29c   : > { %v2767_v62 = vpop.eup %2766  ;;  %2778 = vrcp.f32 %v862_v58  ;;  %v848_v63 = vmul.f32 1.442695, %v823_v59 }
 0x29d   : > { %v2769_v0 = vpop.eup %2768  ;;  %v865_v1 = vadd.f32 1.0, %v2767_v62  ;;  %2780 = vpow2.f32 %v842_v56  ;;  %v846_v2 = vmul.f32 1.442695, %v822_v61  ;;  %v2502_v3 = vpop.f32.mrb[4].mxu1 }
 0x29e   : > { %v864_v4 = vadd.f32 1.0, %v2769_v0  ;;  %2782 = vpow2.f32 %v848_v63  ;;  %v825_v5 = vsub.f32 0.0, %v2502_v3  ;;  %v785_v6 = vpop.f32.mrb[5].mxu1 }
 0x29f   : > { %2784 = vrcp.f32 %v865_v1  ;;  %v824_v7 = vsub.f32 0.0, %v785_v6 }
 0x2a0   : > { %v2771_v9 = vpop.eup %2770  ;;  %2786 = vrcp.f32 %v864_v4  ;;  %v852_v10 = vmul.f32 1.442695, %v825_v5 }
 0x2a1   : > { %v2773_v11 = vpop.eup %2772  ;;  %v867_v12 = vadd.f32 1.0, %v2771_v9  ;;  %2788 = vpow2.f32 %v846_v2  ;;  %v850_v13 = vmul.f32 1.442695, %v824_v7  ;;  %v2505_v14 = vpop.f32.mrb[6].mxu1 }
 0x2a2   : > { %v866_v15 = vadd.f32 1.0, %v2773_v11  ;;  %2790 = vpow2.f32 %v852_v10  ;;  %v827_v16 = vsub.f32 0.0, %v2505_v14  ;;  %v795_v17 = vpop.f32.mrb[7].mxu1 }
 0x2a3   : > { %2792 = vrcp.f32 %v867_v12  ;;  %v826_v18 = vsub.f32 0.0, %v795_v17 }
 0x2a4   : > { %v2775_v34 = vpop.eup %2774  ;;  %2794 = vrcp.f32 %v866_v15  ;;  %v856_v35 = vmul.f32 1.442695, %v827_v16 }
 0x2a5   : > { %v2777_v36 = vpop.eup %2776  ;;  %v869_v37 = vadd.f32 1.0, %v2775_v34  ;;  %2796 = vpow2.f32 %v850_v13  ;;  %v854_v38 = vmul.f32 1.442695, %v826_v18  ;;  %v2508_v39 = vpop.f32.mrb[8].mxu1 }
 0x2a6   : > { %v2779_v40 = vpop.eup %2778  ;;  %2798 = vpow2.f32 %v856_v35  ;;  %v829_v41 = vsub.f32 0.0, %v2508_v39  ;;  %v805_v42 = vpop.f32.mrb[9].mxu1  ;;  %v911_v47 = vmul.f32 %v2777_v36, %v3521_v19 }
 0x2a7   : > { %v2781_v43 = vpop.eup %2780  ;;  %2800 = vrcp.f32 %v869_v37  ;;  %v828_v44 = vsub.f32 0.0, %v805_v42  ;;  %v910_v45 = vmul.f32 %v2779_v40, %v3516_v8 }
 0x2a8   : > { %v2783_v46 = vpop.eup %2782  ;;  %v868_v48 = vadd.f32 1.0, %v2781_v43  ;;  %2802 = vpow2.f32 %v854_v38  ;;  %v860_v49 = vmul.f32 1.442695, %v829_v41 }
 0x2a9   : > { %v2785_v50 = vpop.eup %2784  ;;  %v871_v51 = vadd.f32 1.0, %v2783_v46  ;;  %v858_v52 = vmul.f32 1.442695, %v828_v44  ;;  %2525 = vmatprep.mubr.msk.f32.mxu1 %vm406_vm0, %v910_v45 }
 0x2aa   : > { %v2787_v53 = vpop.eup %2786  ;;  %2804 = vrcp.f32 %v868_v48  ;;  %2526 = vmatmul.mubr.msk.f32.vlgmr.msra.gmra.mrb[10].mxu1 %vm406_vm0, %v911_v47  ;;  %v913_v19 = vmul.f32 %v2785_v50, %v3531_v21 }
 0x2ab   : > { %v2789_v54 = vpop.eup %2788  ;;  %2806 = vrcp.f32 %v871_v51  ;;  %v912_v55 = vmul.f32 %v2787_v53, %v3524_v20 }
 0x2ac   : > { %v2791_v8 = vpop.eup %2790  ;;  %v870_v56 = vadd.f32 1.0, %v2789_v54  ;;  %2808 = vpow2.f32 %v860_v49 }
 0x2ad   : > { %v2793_v57 = vpop.eup %2792  ;;  %v873_v58 = vadd.f32 1.0, %v2791_v8  ;;  %2810 = vpow2.f32 %v858_v52  ;;  %2528 = vmatprep.mubr.msk.f32.mxu1 %vm406_vm0, %v912_v55 }
 0x2ae   : > { %v2795_v59 = vpop.eup %2794  ;;  %2812 = vrcp.f32 %v870_v56  ;;  %2529 = vmatmul.mubr.msk.f32.gmra.mrb[12].mxu1 %vm406_vm0, %v913_v19  ;;  %v915_v60 = vmul.f32 %v2793_v57, %v3541_v23 }
 0x2af   : > { %v2797_v61 = vpop.eup %2796  ;;  %2814 = vrcp.f32 %v873_v58  ;;  %v914_v20 = vmul.f32 %v2795_v59, %v3534_v22 }
 0x2b0   : > { %v2799_v62 = vpop.eup %2798  ;;  %v872_v63 = vadd.f32 1.0, %v2797_v61 }
 0x2b1   : > { %v2801_v0 = vpop.eup %2800  ;;  %v875_v1 = vadd.f32 1.0, %v2799_v62  ;;  %2531 = vmatprep.mubr.msk.f32.mxu1 %vm406_vm0, %v914_v20 }
 0x2b2   : > { %v2803_v21 = vpop.eup %2802  ;;  %2816 = vrcp.f32 %v872_v63  ;;  %2532 = vmatmul.mubr.msk.f32.gmra.mrb[14].mxu1 %vm406_vm0, %v915_v60  ;;  %v917_v4 = vmul.f32 %v2801_v0, %v3551_v25 }
 0x2b3   : > { %2818 = vrcp.f32 %v875_v1  ;;  %v874_v2 = vadd.f32 1.0, %v2803_v21 }
 0x2b4   : > { %v2805_v3 = vpop.eup %2804 }
 0x2b5   : > { %v2807_v23 = vpop.eup %2806  ;;  %2820 = vrcp.f32 %v874_v2  ;;  %v916_v5 = vmul.f32 %v2805_v3, %v3544_v24 }
 0x2b6   : > { %v2809_v22 = vpop.eup %2808  ;;  %v919_v11 = vmul.f32 %v2807_v23, %v3561_v27 }
 0x2b7   : > { %v2811_v6 = vpop.eup %2810  ;;  %v877_v7 = vadd.f32 1.0, %v2809_v22  ;;  %2534 = vmatprep.mubr.msk.f32.mxu1 %vm406_vm0, %v916_v5 }
 0x2b8   : > { %v2813_v9 = vpop.eup %2812  ;;  %v876_v10 = vadd.f32 1.0, %v2811_v6  ;;  %2535 = vmatmul.mubr.msk.f32.gmra.mrb[16].mxu1 %vm406_vm0, %v917_v4 }
 0x2b9   : > { %v2815_v12 = vpop.eup %2814  ;;  %2822 = vrcp.f32 %v877_v7  ;;  %v918_v13 = vmul.f32 %v2813_v9, %v3554_v26 }
 0x2ba   : > { %2824 = vrcp.f32 %v876_v10  ;;  %v921_v24 = vmul.f32 %v2815_v12, %v3571_v29 }
 0x2bb   : > { %2537 = vmatprep.mubr.msk.f32.mxu1 %vm406_vm0, %v918_v13 }
 0x2bc   : > { %v2817_v25 = vpop.eup %2816  ;;  %2538 = vmatmul.mubr.msk.f32.gmra.mrb[18].mxu1 %vm406_vm0, %v919_v11 }
 0x2bd   : > { %v2819_v14 = vpop.eup %2818  ;;  %v920_v15 = vmul.f32 %v2817_v25, %v3564_v28  ;;  %v935_v28 = vlaneseq }
 0x2be   : > { %v923_v26 = vmul.f32 %v2819_v14, %v3581_v31  ;;  %v3646_v31 = vld [vmem:[#allocation13] sm:$0xff] }
 0x2bf   : > { %v2821_v16 = vpop.eup %2820  ;;  %2540 = vmatprep.mubr.msk.f32.mxu1 %vm406_vm0, %v920_v15  ;;  %v3643_v35 = vshrl.u32 %v935_v28, 7 }
 0x2c0   : > { %2541 = vmatmul.mubr.msk.f32.gmra.mrb[20].mxu1 %vm406_vm0, %v921_v24  ;;  %v922_v27 = vmul.f32 %v2821_v16, %v3574_v30 }
 0x2c1   : > { %v937_v30 = vsub.s32 0, %v3643_v35 }
 0x2c2   : > { %2543 = vmatprep.mubr.msk.f32.mxu1 %vm406_vm0, %v922_v27 }
 0x2c3   : > { %v2823_v17 = vpop.eup %2822  ;;  %v938_v36 = vrot.slane %v3646_v31, %v937_v30 }
 0x2c4   : > { %v2825_v18 = vpop.eup %2824  ;;  %2544 = vmatmul.mubr.msk.f32.gmra.mrb[22].mxu1 %vm406_vm0, %v923_v26  ;;  %v925_v29 = vmul.f32 %v2823_v17, %v3591_v33 }
 0x2c5   : > { %v924_v34 = vmul.f32 %v2825_v18, %v3584_v32 }
 0x2c7   : > { %2546 = vmatprep.mubr.msk.f32.mxu1 %vm406_vm0, %v924_v34 }
 0x2c8   : > { %2547 = vmatmul.mubr.msk.f32.gmra.mrb[24].mxu1 %vm406_vm0, %v925_v29 }
 0x37d   : > { %v2527_v37 = vpop.f32.mrb[10].mxu1 }
 0x37e   : > { %v1053_v38 = vpop.f32.mrb[11].mxu1  ;;  %v3651_v33 = vadd.f32 %v2527_v37, %v938_v36 }
 0x37f   : > { %v3649_v39 = vadd.f32 %v1053_v38, %v938_v36 }
 0x380   : > { %v1136_v46 = vsel %vm1132_vm2, %v3651_v33, 0.0 }
 0x381   : > { %v2530_v32 = vpop.f32.mrb[12].mxu1  ;;  %v1133_v40 = vsel %vm1132_vm2, %v3649_v39, 0.0 }
 0x382   : > { %v1063_v41 = vpop.f32.mrb[13].mxu1  ;;  %1134 = vadd.xlane.f32.xlu0 %v1133_v40  ;;  %v3657_v43 = vadd.f32 %v2530_v32, %v938_v36 }
 0x383   : > { %v3655_v42 = vadd.f32 %v1063_v41, %v938_v36 }
 0x384   : > { %v1142_v50 = vsel %vm1132_vm2, %v3657_v43, 0.0 }
 0x385   : > { %v2533_v44 = vpop.f32.mrb[14].mxu1  ;;  %v1139_v45 = vsel %vm1132_vm2, %v3655_v42, 0.0 }
 0x386   : > { %v1073_v47 = vpop.f32.mrb[15].mxu1  ;;  %1140 = vadd.xlane.f32.xlu1 %v1139_v45  ;;  %1137 = vadd.xlane.f32.xlu0 %v1136_v46  ;;  %v3665_v49 = vadd.f32 %v2533_v44, %v938_v36 }
 0x387   : > { %v3663_v48 = vadd.f32 %v1073_v47, %v938_v36 }
 0x388   : > { %v1148_v8 = vsel %vm1132_vm2, %v3665_v49, 0.0 }
 0x389   : > { %v1145_v51 = vsel %vm1132_vm2, %v3663_v48, 0.0 }
 0x38a   : > { %1143 = vadd.xlane.f32.xlu1 %v1142_v50  ;;  %1146 = vadd.xlane.f32.xlu0 %v1145_v51 }
 0x38b   : > { %v2536_v52 = vpop.f32.mrb[16].mxu1 }
 0x38c   : > { %v1083_v53 = vpop.f32.mrb[17].mxu1  ;;  %v3671_v54 = vadd.f32 %v2536_v52, %v938_v36 }
 0x38d   : > { %v3673_v55 = vadd.f32 %v1083_v53, %v938_v36 }
 0x38e   : > { %1149 = vadd.xlane.f32.xlu1 %v1148_v8  ;;  %v1154_v60 = vsel %vm1132_vm2, %v3671_v54, 0.0 }
 0x38f   : > { %v2539_v56 = vpop.f32.mrb[18].mxu1  ;;  %v1151_v19 = vsel %vm1132_vm2, %v3673_v55, 0.0 }
 0x390   : > { %v1093_v57 = vpop.f32.mrb[19].mxu1  ;;  %1152 = vadd.xlane.f32.xlu0 %v1151_v19  ;;  %v3679_v58 = vadd.f32 %v2539_v56, %v938_v36 }
 0x391   : > { %v3681_v59 = vadd.f32 %v1093_v57, %v938_v36 }
 0x392   : > { %1155 = vadd.xlane.f32.xlu1 %v1154_v60  ;;  %v1160_v1 = vsel %vm1132_vm2, %v3679_v58, 0.0 }
 0x393   : > { %v2542_v61 = vpop.f32.mrb[20].mxu1  ;;  %v1157_v20 = vsel %vm1132_vm2, %v3681_v59, 0.0 }
 0x394   : > { %v1103_v62 = vpop.f32.mrb[21].mxu1  ;;  %1158 = vadd.xlane.f32.xlu0 %v1157_v20  ;;  %v3687_v63 = vadd.f32 %v2542_v61, %v938_v36 }
 0x395   : > { %v3689_v0 = vadd.f32 %v1103_v62, %v938_v36 }
 0x396   : > { %1161 = vadd.xlane.f32.xlu1 %v1160_v1  ;;  %v1166_v5 = vsel %vm1132_vm2, %v3687_v63, 0.0 }
 0x397   : > { %v2545_v21 = vpop.f32.mrb[22].mxu1  ;;  %v1163_v2 = vsel %vm1132_vm2, %v3689_v0, 0.0 }
 0x398   : > { %v1113_v3 = vpop.f32.mrb[23].mxu1  ;;  %1164 = vadd.xlane.f32.xlu0 %v1163_v2  ;;  %v3695_v4 = vadd.f32 %v2545_v21, %v938_v36 }
 0x399   : > { %v3697_v23 = vadd.f32 %v1113_v3, %v938_v36 }
 0x39a   : > { %1167 = vadd.xlane.f32.xlu1 %v1166_v5  ;;  %v1172_v11 = vsel %vm1132_vm2, %v3695_v4, 0.0 }
 0x39b   : > { %v2548_v22 = vpop.f32.mrb[24].mxu1  ;;  %v1169_v6 = vsel %vm1132_vm2, %v3697_v23, 0.0 }
 0x39c   : > { %1170 = vadd.xlane.f32.xlu0 %v1169_v6  ;;  %v1123_v7 = vpop.f32.mrb[25].mxu1  ;;  %v3703_v9 = vadd.f32 %v2548_v22, %v938_v36 }
 0x39d   : > { %v3705_v10 = vadd.f32 %v1123_v7, %v938_v36 }
 0x39e   : > { %1173 = vadd.xlane.f32.xlu1 %v1172_v11  ;;  %v1178_v13 = vsel %vm1132_vm2, %v3703_v9, 0.0 }
 0x39f   : > { %v1175_v12 = vsel %vm1132_vm2, %v3705_v10, 0.0 }
 0x3a0   : > { %1176 = vadd.xlane.f32.xlu0 %v1175_v12 }
 0x3a2   : > { %1179 = vadd.xlane.f32.xlu1 %v1178_v13 }
 0x40f   : > { %v1135_v25 = vpop.xlane.xlu0 %1134 }
 0x410   : > { %v1182_v24 = vmul.f32 0.0625, %v1135_v25 }
 0x412   : > { %v3714_v14 = vsub.f32 %v3649_v39, %v1182_v24 }
 0x413   : > { %v1141_v15 = vpop.xlane.xlu1 %1140  ;;  %v1138_v16 = vpop.xlane.xlu0 %1137 }
 0x414   : > { %v1184_v27 = vmul.f32 0.0625, %v1141_v15  ;;  %v1183_v26 = vmul.f32 0.0625, %v1138_v16  ;;  %v1214_v17 = vmul.f32 %v3714_v14, %v3714_v14 }
 0x416   : > { %v3719_v18 = vsub.f32 %v3655_v42, %v1184_v27  ;;  %v3722_v29 = vsub.f32 %v3651_v33, %v1183_v26  ;;  %v1230_v34 = vsel %vm1132_vm2, %v1214_v17, 0.0 }
 0x417   : > { %v1144_v28 = vpop.xlane.xlu1 %1143  ;;  %v1147_v30 = vpop.xlane.xlu0 %1146  ;;  %1231 = vadd.xlane.f32.xlu0 %v1230_v34 }
 0x418   : > { %v1185_v36 = vmul.f32 0.0625, %v1144_v28  ;;  %v1186_v37 = vmul.f32 0.0625, %v1147_v30  ;;  %v1215_v38 = vmul.f32 %v3722_v29, %v3722_v29  ;;  %v1216_v39 = vmul.f32 %v3719_v18, %v3719_v18 }
 0x41a   : > { %v3730_v32 = vsub.f32 %v3657_v43, %v1185_v36  ;;  %v3733_v40 = vsub.f32 %v3663_v48, %v1186_v37  ;;  %v1233_v33 = vsel %vm1132_vm2, %v1215_v38, 0.0  ;;  %v1236_v41 = vsel %vm1132_vm2, %v1216_v39, 0.0 }
 0x41b   : > { %v1150_v42 = vpop.xlane.xlu1 %1149  ;;  %1234 = vadd.xlane.f32.xlu1 %v1233_v33  ;;  %1237 = vadd.xlane.f32.xlu0 %v1236_v41 }
 0x41c   : > { %v1187_v44 = vmul.f32 0.0625, %v1150_v42  ;;  %v1217_v45 = vmul.f32 %v3730_v32, %v3730_v32  ;;  %v1218_v46 = vmul.f32 %v3733_v40, %v3733_v40 }
 0x41d   : > { %v1153_v47 = vpop.xlane.xlu0 %1152 }
 0x41e   : > { %v3742_v43 = vsub.f32 %v3665_v49, %v1187_v44  ;;  %v1188_v48 = vmul.f32 0.0625, %v1153_v47  ;;  %v1239_v50 = vsel %vm1132_vm2, %v1217_v45, 0.0  ;;  %v1242_v51 = vsel %vm1132_vm2, %v1218_v46, 0.0  ;;  %v1398_v46 = vld [vmem:[#allocation10] sm:$0xff]  ;;  %v1399_v47 = vld [vmem:[#allocation10 + $0x8] sm:$0xff] }
 0x41f   : > { %v1156_v52 = vpop.xlane.xlu1 %1155  ;;  %1240 = vadd.xlane.f32.xlu1 %v1239_v50  ;;  %1243 = vadd.xlane.f32.xlu0 %v1242_v51 }
 0x420   : > { %v3747_v53 = vsub.f32 %v3673_v55, %v1188_v48  ;;  %v1189_v8 = vmul.f32 0.0625, %v1156_v52  ;;  %v1219_v56 = vmul.f32 %v3742_v43, %v3742_v43  ;;  %v2643_v48 = vpack.c.bf16 %v1399_v47, %v1398_v46 }
 0x421   : > { %v1159_v19 = vpop.xlane.xlu0 %1158 }
 0x422   : > { %v3752_v57 = vsub.f32 %v3671_v54, %v1189_v8  ;;  %v1190_v49 = vmul.f32 0.0625, %v1159_v19  ;;  %v1245_v60 = vsel %vm1132_vm2, %v1219_v56, 0.0  ;;  %v1220_v61 = vmul.f32 %v3747_v53, %v3747_v53  ;;  %2644 = vmatprep.subr.bf16.mxu0 %v2643_v48 }
 0x423   : > { %v1162_v20 = vpop.xlane.xlu1 %1161  ;;  %1246 = vadd.xlane.f32.xlu1 %v1245_v60  ;;  %2646 = vmatpush3.bf16.msra.mxu0 %v2643_v48 }
 0x424   : > { %v3758_v62 = vsub.f32 %v3681_v59, %v1190_v49  ;;  %v1191_v55 = vmul.f32 0.0625, %v1162_v20  ;;  %v1248_v1 = vsel %vm1132_vm2, %v1220_v61, 0.0  ;;  %v1221_v21 = vmul.f32 %v3752_v57, %v3752_v57 }
 0x425   : > { %v1165_v2 = vpop.xlane.xlu0 %1164  ;;  %1249 = vadd.xlane.f32.xlu0 %v1248_v1 }
 0x426   : > { %v3764_v54 = vsub.f32 %v3679_v58, %v1191_v55  ;;  %v1192_v3 = vmul.f32 0.0625, %v1165_v2  ;;  %v1251_v5 = vsel %vm1132_vm2, %v1221_v21, 0.0  ;;  %v1222_v22 = vmul.f32 %v3758_v62, %v3758_v62 }
 0x427   : > { %v1168_v6 = vpop.xlane.xlu1 %1167  ;;  %1252 = vadd.xlane.f32.xlu1 %v1251_v5  ;;  %v1344_v21 = vsub.s32 1, %v3643_v35  ;;  %v1364_v5 = vsub.s32 2, %v3643_v35 }
 0x428   : > { %v3770_v59 = vsub.f32 %v3689_v0, %v1192_v3  ;;  %v1193_v7 = vmul.f32 0.0625, %v1168_v6  ;;  %v1254_v11 = vsel %vm1132_vm2, %v1222_v22, 0.0  ;;  %v1223_v12 = vmul.f32 %v3764_v54, %v3764_v54 }
 0x429   : > { %v1171_v13 = vpop.xlane.xlu0 %1170  ;;  %1255 = vadd.xlane.f32.xlu0 %v1254_v11 }
 0x42a   : > { %v3776_v58 = vsub.f32 %v3687_v63, %v1193_v7  ;;  %v1194_v25 = vmul.f32 0.0625, %v1171_v13  ;;  %v1257_v24 = vsel %vm1132_vm2, %v1223_v12, 0.0  ;;  %v1224_v15 = vmul.f32 %v3770_v59, %v3770_v59 }
 0x42b   : > { %v1174_v16 = vpop.xlane.xlu1 %1173  ;;  %1258 = vadd.xlane.f32.xlu1 %v1257_v24  ;;  %v3812_v7 = vrot.slane %v3646_v31, %v1344_v21  ;;  %v3815_v24 = vrot.slane %v3646_v31, %v1364_v5 }
 0x42c   : > { %v3782_v0 = vsub.f32 %v3697_v23, %v1194_v25  ;;  %v1195_v27 = vmul.f32 0.0625, %v1174_v16  ;;  %v1260_v26 = vsel %vm1132_vm2, %v1224_v15, 0.0  ;;  %v1225_v17 = vmul.f32 %v3776_v58, %v3776_v58 }
 0x42d   : > { %1261 = vadd.xlane.f32.xlu0 %v1260_v26  ;;  %v1177_v63 = vpop.xlane.xlu0 %1176 }
 0x42e   : > { %v3788_v34 = vsub.f32 %v3695_v4, %v1195_v27  ;;  %v1196_v28 = vmul.f32 0.0625, %v1177_v63  ;;  %v1263_v30 = vsel %vm1132_vm2, %v1225_v17, 0.0  ;;  %v1226_v36 = vmul.f32 %v3782_v0, %v3782_v0 }
 0x42f   : > { %1264 = vadd.xlane.f32.xlu1 %v1263_v30  ;;  %v1180_v23 = vpop.xlane.xlu1 %1179 }
 0x430   : > { %v3794_v37 = vsub.f32 %v3705_v10, %v1196_v28  ;;  %v1197_v38 = vmul.f32 0.0625, %v1180_v23  ;;  %v1266_v39 = vsel %vm1132_vm2, %v1226_v36, 0.0  ;;  %v1227_v33 = vmul.f32 %v3788_v34, %v3788_v34 }
 0x431   : > { %1267 = vadd.xlane.f32.xlu0 %v1266_v39 }
 0x432   : > { %v3800_v4 = vsub.f32 %v3703_v9, %v1197_v38  ;;  %v1269_v41 = vsel %vm1132_vm2, %v1227_v33, 0.0  ;;  %v1228_v42 = vmul.f32 %v3794_v37, %v3794_v37 }
 0x433   : > { %1270 = vadd.xlane.f32.xlu1 %v1269_v41 }
 0x434   : > { %v1272_v44 = vsel %vm1132_vm2, %v1228_v42, 0.0  ;;  %v1229_v10 = vmul.f32 %v3800_v4, %v3800_v4 }
 0x435   : > { %1273 = vadd.xlane.f32.xlu0 %v1272_v44 }
 0x436   : > { %v1275_v45 = vsel %vm1132_vm2, %v1229_v10, 0.0 }
 0x437   : > { %1276 = vadd.xlane.f32.xlu1 %v1275_v45 }
 0x4a4   : > { %v1232_v9 = vpop.xlane.xlu0 %1231 }
 0x4a5   : > { %v1278_v50 = vmul.f32 0.0625, %v1232_v9 }
 0x4a7   : > { %v1294_v51 = vadd.f32 1e-05, %v1278_v50 }
 0x4a8   : > { %v1235_v52 = vpop.xlane.xlu1 %1234  ;;  %v1238_v8 = vpop.xlane.xlu0 %1237 }
 0x4a9   : > { %2826 = vrsqrt.f32 %v1294_v51  ;;  %v1279_v56 = vmul.f32 0.0625, %v1235_v52  ;;  %v1280_v19 = vmul.f32 0.0625, %v1238_v8 }
 0x4ab   : > { %v1295_v49 = vadd.f32 1e-05, %v1279_v56  ;;  %v1296_v60 = vadd.f32 1e-05, %v1280_v19 }
 0x4ac   : > { %v1241_v61 = vpop.xlane.xlu1 %1240  ;;  %v1244_v20 = vpop.xlane.xlu0 %1243 }
 0x4ad   : > { %2828 = vrsqrt.f32 %v1295_v49  ;;  %v1281_v55 = vmul.f32 0.0625, %v1241_v61  ;;  %v1282_v1 = vmul.f32 0.0625, %v1244_v20 }
 0x4ae   : > { %2830 = vrsqrt.f32 %v1296_v60 }
 0x4af   : > { %v1297_v2 = vadd.f32 1e-05, %v1281_v55  ;;  %v1298_v3 = vadd.f32 1e-05, %v1282_v1 }
 0x4b0   : > { %v1247_v22 = vpop.xlane.xlu1 %1246 }
 0x4b1   : > { %2832 = vrsqrt.f32 %v1297_v2  ;;  %v1283_v6 = vmul.f32 0.0625, %v1247_v22 }
 0x4b2   : > { %2834 = vrsqrt.f32 %v1298_v3  ;;  %v1250_v11 = vpop.xlane.xlu0 %1249 }
 0x4b3   : > { %v2827_v12 = vpop.eup %2826  ;;  %v1299_v13 = vadd.f32 1e-05, %v1283_v6  ;;  %v1284_v25 = vmul.f32 0.0625, %v1250_v11 }
 0x4b4   : > { %v1253_v15 = vpop.xlane.xlu1 %1252  ;;  %v1326_v16 = vmul.f32 %v2827_v12, %v3714_v14 }
 0x4b5   : > { %2836 = vrsqrt.f32 %v1299_v13  ;;  %v1300_v27 = vadd.f32 1e-05, %v1284_v25  ;;  %v1285_v26 = vmul.f32 0.0625, %v1253_v15 }
 0x4b6   : > { %v1256_v17 = vpop.xlane.xlu0 %1255  ;;  %v1346_v63 = vmul.f32 %v3812_v7, %v1326_v16 }
 0x4b7   : > { %v2829_v28 = vpop.eup %2828  ;;  %2838 = vrsqrt.f32 %v1300_v27  ;;  %v1301_v30 = vadd.f32 1e-05, %v1285_v26  ;;  %v1286_v36 = vmul.f32 0.0625, %v1256_v17 }
 0x4b8   : > { %v2831_v23 = vpop.eup %2830  ;;  %v1327_v38 = vmul.f32 %v2829_v28, %v3722_v29  ;;  %v1259_v39 = vpop.xlane.xlu1 %1258  ;;  %v1366_v33 = vadd.f32 %v3815_v24, %v1346_v63 }
 0x4b9   : > { %2840 = vrsqrt.f32 %v1301_v30  ;;  %v1302_v41 = vadd.f32 1e-05, %v1286_v36  ;;  %v1287_v42 = vmul.f32 0.0625, %v1259_v39  ;;  %v1328_v14 = vmul.f32 %v2831_v23, %v3719_v18 }
 0x4ba   : > { %v1347_v44 = vmul.f32 %v3812_v7, %v1327_v38  ;;  %v1262_v10 = vpop.xlane.xlu0 %1261  ;;  %v1382_v45 = vmax.f32 %v1366_v33, 0.0 }
 0x4bb   : > { %v2833_v46 = vpop.eup %2832  ;;  %2842 = vrsqrt.f32 %v1302_v41  ;;  %v1303_v47 = vadd.f32 1e-05, %v1287_v42  ;;  %v1288_v48 = vmul.f32 0.0625, %v1262_v10  ;;  %v1348_v9 = vmul.f32 %v3812_v7, %v1328_v14 }
 0x4bc   : > { %v2835_v50 = vpop.eup %2834  ;;  %v1367_v29 = vadd.f32 %v3815_v24, %v1347_v44  ;;  %v1265_v51 = vpop.xlane.xlu1 %1264  ;;  %2553 = vmatprep.mubr.msk.f32.mxu0 %vm1132_vm2, %v1382_v45  ;;  %v1329_v52 = vmul.f32 %v2833_v46, %v3730_v32 }
 0x4bd   : > { %2844 = vrsqrt.f32 %v1303_v47  ;;  %v1304_v18 = vadd.f32 1e-05, %v1288_v48  ;;  %v1289_v8 = vmul.f32 0.0625, %v1265_v51  ;;  %v1368_v56 = vadd.f32 %v3815_v24, %v1348_v9 }
 0x4be   : > { %v1383_v19 = vmax.f32 %v1367_v29, 0.0  ;;  %v1268_v49 = vpop.xlane.xlu0 %1267  ;;  %v1349_v60 = vmul.f32 %v3812_v7, %v1329_v52  ;;  %v1330_v61 = vmul.f32 %v2835_v50, %v3733_v40 }
 0x4bf   : > { %v2837_v20 = vpop.eup %2836  ;;  %2846 = vrsqrt.f32 %v1304_v18  ;;  %v1305_v55 = vadd.f32 1e-05, %v1289_v8  ;;  %v1290_v1 = vmul.f32 0.0625, %v1268_v49  ;;  %v1384_v21 = vmax.f32 %v1368_v56, 0.0 }
 0x4c0   : > { %v1271_v2 = vpop.xlane.xlu1 %1270  ;;  %2554 = vmatmul.mubr.msk.f32.vlgmr.msra.gmra.mrb[22].mxu0 %vm1132_vm2, %v1383_v19  ;;  %v1369_v32 = vadd.f32 %v3815_v24, %v1349_v60  ;;  %v1350_v3 = vmul.f32 %v3812_v7, %v1330_v61  ;;  %v1331_v5 = vmul.f32 %v2837_v20, %v3742_v43 }
 0x4c1   : > { %v2839_v22 = vpop.eup %2838  ;;  %2848 = vrsqrt.f32 %v1305_v55  ;;  %v1306_v6 = vadd.f32 1e-05, %v1290_v1  ;;  %v1291_v11 = vmul.f32 0.0625, %v1271_v2  ;;  %2556 = vmatprep.mubr.msk.f32.mxu0 %vm1132_vm2, %v1384_v21 }
 0x4c2   : > { %v1274_v40 = vpop.xlane.xlu0 %1273  ;;  %v1385_v12 = vmax.f32 %v1369_v32, 0.0  ;;  %v1370_v13 = vadd.f32 %v3815_v24, %v1350_v3  ;;  %v1351_v25 = vmul.f32 %v3812_v7, %v1331_v5  ;;  %v1332_v15 = vmul.f32 %v2839_v22, %v3747_v53 }
 0x4c3   : > { %v2841_v16 = vpop.eup %2840  ;;  %2850 = vrsqrt.f32 %v1306_v6  ;;  %v1307_v27 = vadd.f32 1e-05, %v1291_v11  ;;  %v1292_v26 = vmul.f32 0.0625, %v1274_v40 }
 0x4c4   : > { %v1277_v17 = vpop.xlane.xlu1 %1276  ;;  %2557 = vmatmul.mubr.msk.f32.gmra.mrb[24].mxu0 %vm1132_vm2, %v1385_v12  ;;  %v1386_v43 = vmax.f32 %v1370_v13, 0.0  ;;  %v1371_v63 = vadd.f32 %v3815_v24, %v1351_v25  ;;  %v1352_v28 = vmul.f32 %v3812_v7, %v1332_v15  ;;  %v1333_v30 = vmul.f32 %v2841_v16, %v3752_v57 }
 0x4c5   : > { %v2843_v36 = vpop.eup %2842  ;;  %2852 = vrsqrt.f32 %v1307_v27  ;;  %v1308_v23 = vadd.f32 1e-05, %v1292_v26  ;;  %v1293_v38 = vmul.f32 0.0625, %v1277_v17  ;;  %v1402_v25 = vsub.s32 3, %v3643_v35 }
 0x4c6   : > { %2559 = vmatprep.mubr.msk.f32.mxu0 %vm1132_vm2, %v1386_v43  ;;  %v1387_v53 = vmax.f32 %v1371_v63, 0.0  ;;  %v1372_v39 = vadd.f32 %v3815_v24, %v1352_v28  ;;  %v1353_v33 = vmul.f32 %v3812_v7, %v1333_v30  ;;  %v1334_v41 = vmul.f32 %v2843_v36, %v3758_v62 }
 0x4c7   : > { %v2845_v42 = vpop.eup %2844  ;;  %2854 = vrsqrt.f32 %v1308_v23  ;;  %v1309_v14 = vadd.f32 1e-05, %v1293_v38 }
 0x4c8   : > { %2560 = vmatmul.mubr.msk.f32.gmra.mrb[26].mxu0 %vm1132_vm2, %v1387_v53  ;;  %v1388_v44 = vmax.f32 %v1372_v39, 0.0  ;;  %v1373_v57 = vadd.f32 %v3815_v24, %v1353_v33  ;;  %v1354_v10 = vmul.f32 %v3812_v7, %v1334_v41  ;;  %v1335_v45 = vmul.f32 %v2845_v42, %v3764_v54 }
 0x4c9   : > { %v2847_v46 = vpop.eup %2846  ;;  %2856 = vrsqrt.f32 %v1309_v14 }
 0x4ca   : > { %2562 = vmatprep.mubr.msk.f32.mxu0 %vm1132_vm2, %v1388_v44  ;;  %v1389_v47 = vmax.f32 %v1373_v57, 0.0  ;;  %v1374_v48 = vadd.f32 %v3815_v24, %v1354_v10  ;;  %v1355_v62 = vmul.f32 %v3812_v7, %v1335_v45  ;;  %v1336_v9 = vmul.f32 %v2847_v46, %v3770_v59 }
 0x4cb   : > { %v2849_v50 = vpop.eup %2848 }
 0x4cc   : > { %2563 = vmatmul.mubr.msk.f32.gmra.mrb[28].mxu0 %vm1132_vm2, %v1389_v47  ;;  %v1390_v29 = vmax.f32 %v1374_v48, 0.0  ;;  %v1375_v51 = vadd.f32 %v3815_v24, %v1355_v62  ;;  %v1356_v52 = vmul.f32 %v3812_v7, %v1336_v9  ;;  %v1337_v54 = vmul.f32 %v2849_v50, %v3776_v58 }
 0x4cd   : > { %v2851_v18 = vpop.eup %2850 }
 0x4ce   : > { %2565 = vmatprep.mubr.msk.f32.mxu0 %vm1132_vm2, %v1390_v29  ;;  %v1391_v8 = vmax.f32 %v1375_v51, 0.0  ;;  %v1376_v56 = vadd.f32 %v3815_v24, %v1356_v52  ;;  %v1357_v19 = vmul.f32 %v3812_v7, %v1337_v54  ;;  %v1338_v59 = vmul.f32 %v2851_v18, %v3782_v0 }
 0x4cf   : > { %v2853_v49 = vpop.eup %2852 }
 0x4d0   : > { %2566 = vmatmul.mubr.msk.f32.gmra.mrb[30].mxu0 %vm1132_vm2, %v1391_v8  ;;  %v1392_v60 = vmax.f32 %v1376_v56, 0.0  ;;  %v1377_v61 = vadd.f32 %v3815_v24, %v1357_v19  ;;  %v1358_v20 = vmul.f32 %v3812_v7, %v1338_v59  ;;  %v1339_v58 = vmul.f32 %v2853_v49, %v3788_v34 }
 0x4d1   : > { %v2855_v55 = vpop.eup %2854 }
 0x4d2   : > { %2568 = vmatprep.mubr.msk.f32.mxu0 %vm1132_vm2, %v1392_v60  ;;  %v1393_v1 = vmax.f32 %v1377_v61, 0.0  ;;  %v1378_v21 = vadd.f32 %v3815_v24, %v1358_v20  ;;  %v1359_v2 = vmul.f32 %v3812_v7, %v1339_v58  ;;  %v1340_v0 = vmul.f32 %v2855_v55, %v3794_v37 }
 0x4d3   : > { %v2857_v32 = vpop.eup %2856 }
 0x4d4   : > { %2569 = vmatmul.mubr.msk.f32.gmra.mrb[32].mxu0 %vm1132_vm2, %v1393_v1  ;;  %v1394_v3 = vmax.f32 %v1378_v21, 0.0  ;;  %v1379_v5 = vadd.f32 %v3815_v24, %v1359_v2  ;;  %v1360_v22 = vmul.f32 %v3812_v7, %v1340_v0  ;;  %v1341_v34 = vmul.f32 %v2857_v32, %v3800_v4  ;;  %v1863_v2 = vld [vmem:[#allocation11] sm:$0xf] }
 0x4d5   : > { %v1403_v4 = vrot.slane %v3646_v31, %v1402_v25  ;;  %2577 = vmatprep.subr.msk.mxu1 %vm1916_vm4, %v1863_v2 }
 0x4d6   : > { %2571 = vmatprep.mubr.msk.f32.mxu0 %vm1132_vm2, %v1394_v3  ;;  %v1395_v6 = vmax.f32 %v1379_v5, 0.0  ;;  %v1380_v11 = vadd.f32 %v3815_v24, %v1360_v22  ;;  %v1361_v40 = vmul.f32 %v3812_v7, %v1341_v34  ;;  %2578 = vmatpush3.msk.msra.mxu1 %vm1916_vm4, %v1863_v2 }
 0x4d8   : > { %2572 = vmatmul.mubr.msk.f32.gmra.mrb[34].mxu0 %vm1132_vm2, %v1395_v6  ;;  %v1396_v37 = vmax.f32 %v1380_v11, 0.0  ;;  %v1381_v12 = vadd.f32 %v3815_v24, %v1361_v40 }
 0x4da   : > { %2574 = vmatprep.mubr.msk.f32.mxu0 %vm1132_vm2, %v1396_v37  ;;  %v1397_v13 = vmax.f32 %v1381_v12, 0.0 }
 0x4dc   : > { %2575 = vmatmul.mubr.msk.f32.gmra.mrb[36].mxu0 %vm1132_vm2, %v1397_v13 }
 0x593   : > { %v2555_v15 = vpop.f32.mrb[22].mxu0 }
 0x594   : > { %v3883_v16 = vadd.f32 %v2555_v15, %v1403_v4  ;;  %v1518_v27 = vpop.f32.mrb[23].mxu0 }
 0x595   : > { %v3885_v7 = vadd.f32 %v1518_v27, %v1403_v4 }
 0x596   : > { %v1601_v26 = vsel %vm1597_vm3, %v3883_v16, 0.0 }
 0x597   : > { %1602 = vadd.xlane.f32.xlu1 %v1601_v26  ;;  %v2558_v24 = vpop.f32.mrb[24].mxu0  ;;  %v1598_v17 = vsel %vm1597_vm3, %v3885_v7, 0.0 }
 0x598   : > { %v3891_v43 = vadd.f32 %v2558_v24, %v1403_v4  ;;  %1599 = vadd.xlane.f32.xlu0 %v1598_v17  ;;  %v1528_v63 = vpop.f32.mrb[25].mxu0 }
 0x599   : > { %v3893_v31 = vadd.f32 %v1528_v63, %v1403_v4 }
 0x59a   : > { %v1607_v28 = vsel %vm1597_vm3, %v3891_v43, 0.0 }
 0x59b   : > { %1608 = vadd.xlane.f32.xlu1 %v1607_v28  ;;  %v2561_v30 = vpop.f32.mrb[26].mxu0  ;;  %v1604_v36 = vsel %vm1597_vm3, %v3893_v31, 0.0 }
 0x59c   : > { %v3899_v23 = vadd.f32 %v2561_v30, %v1403_v4  ;;  %1605 = vadd.xlane.f32.xlu0 %v1604_v36  ;;  %v1538_v38 = vpop.f32.mrb[27].mxu0 }
 0x59d   : > { %v3901_v53 = vadd.f32 %v1538_v38, %v1403_v4 }
 0x59e   : > { %v1613_v39 = vsel %vm1597_vm3, %v3899_v23, 0.0 }
 0x59f   : > { %1614 = vadd.xlane.f32.xlu1 %v1613_v39  ;;  %v2564_v33 = vpop.f32.mrb[28].mxu0  ;;  %v1610_v41 = vsel %vm1597_vm3, %v3901_v53, 0.0 }
 0x5a0   : > { %v3907_v42 = vadd.f32 %v2564_v33, %v1403_v4  ;;  %1611 = vadd.xlane.f32.xlu0 %v1610_v41  ;;  %v1548_v14 = vpop.f32.mrb[29].mxu0 }
 0x5a1   : > { %v3909_v44 = vadd.f32 %v1548_v14, %v1403_v4 }
 0x5a2   : > { %v1619_v57 = vsel %vm1597_vm3, %v3907_v42, 0.0 }
 0x5a3   : > { %1620 = vadd.xlane.f32.xlu1 %v1619_v57  ;;  %v2567_v10 = vpop.f32.mrb[30].mxu0  ;;  %v1616_v45 = vsel %vm1597_vm3, %v3909_v44, 0.0 }
 0x5a4   : > { %v3915_v46 = vadd.f32 %v2567_v10, %v1403_v4  ;;  %1617 = vadd.xlane.f32.xlu0 %v1616_v45  ;;  %v1558_v47 = vpop.f32.mrb[31].mxu0 }
 0x5a5   : > { %v3917_v48 = vadd.f32 %v1558_v47, %v1403_v4 }
 0x5a6   : > { %v1625_v62 = vsel %vm1597_vm3, %v3915_v46, 0.0 }
 0x5a7   : > { %1626 = vadd.xlane.f32.xlu1 %v1625_v62  ;;  %v2570_v9 = vpop.f32.mrb[32].mxu0  ;;  %v1622_v50 = vsel %vm1597_vm3, %v3917_v48, 0.0 }
 0x5a8   : > { %v3923_v29 = vadd.f32 %v2570_v9, %v1403_v4  ;;  %1623 = vadd.xlane.f32.xlu0 %v1622_v50  ;;  %v1568_v51 = vpop.f32.mrb[33].mxu0 }
 0x5a9   : > { %v3925_v52 = vadd.f32 %v1568_v51, %v1403_v4 }
 0x5aa   : > { %v1631_v54 = vsel %vm1597_vm3, %v3923_v29, 0.0 }
 0x5ab   : > { %1632 = vadd.xlane.f32.xlu1 %v1631_v54  ;;  %v2573_v18 = vpop.f32.mrb[34].mxu0  ;;  %v1628_v8 = vsel %vm1597_vm3, %v3925_v52, 0.0 }
 0x5ac   : > { %v3931_v56 = vadd.f32 %v2573_v18, %v1403_v4  ;;  %1629 = vadd.xlane.f32.xlu0 %v1628_v8  ;;  %v1578_v19 = vpop.f32.mrb[35].mxu0 }
 0x5ad   : > { %v3933_v59 = vadd.f32 %v1578_v19, %v1403_v4 }
 0x5ae   : > { %v1637_v49 = vsel %vm1597_vm3, %v3931_v56, 0.0 }
 0x5af   : > { %1638 = vadd.xlane.f32.xlu1 %v1637_v49  ;;  %v2576_v60 = vpop.f32.mrb[36].mxu0  ;;  %v1634_v61 = vsel %vm1597_vm3, %v3933_v59, 0.0 }
 0x5b0   : > { %v3939_v20 = vadd.f32 %v2576_v60, %v1403_v4  ;;  %1635 = vadd.xlane.f32.xlu0 %v1634_v61  ;;  %v1588_v58 = vpop.f32.mrb[37].mxu0 }
 0x5b1   : > { %v3941_v55 = vadd.f32 %v1588_v58, %v1403_v4 }
 0x5b2   : > { %v1643_v1 = vsel %vm1597_vm3, %v3939_v20, 0.0 }
 0x5b3   : > { %1644 = vadd.xlane.f32.xlu1 %v1643_v1  ;;  %v1640_v21 = vsel %vm1597_vm3, %v3941_v55, 0.0 }
 0x5b4   : > { %1641 = vadd.xlane.f32.xlu0 %v1640_v21 }
 0x624   : > { %v1603_v0 = vpop.xlane.xlu1 %1602 }
 0x625   : > { %v1648_v32 = vmul.f32 0.25, %v1603_v0  ;;  %v1600_v3 = vpop.xlane.xlu0 %1599 }
 0x626   : > { %v1647_v5 = vmul.f32 0.25, %v1600_v3 }
 0x627   : > { %v3948_v22 = vsub.f32 %v3883_v16, %v1648_v32 }
 0x628   : > { %v3951_v34 = vsub.f32 %v3885_v7, %v1647_v5  ;;  %v1609_v6 = vpop.xlane.xlu1 %1608 }
 0x629   : > { %v1650_v11 = vmul.f32 0.25, %v1609_v6  ;;  %v1606_v40 = vpop.xlane.xlu0 %1605  ;;  %v1680_v37 = vmul.f32 %v3948_v22, %v3948_v22 }
 0x62a   : > { %v1649_v12 = vmul.f32 0.25, %v1606_v40  ;;  %v1679_v13 = vmul.f32 %v3951_v34, %v3951_v34 }
 0x62b   : > { %v3958_v25 = vsub.f32 %v3891_v43, %v1650_v11  ;;  %v1698_v4 = vsel %vm1597_vm3, %v1680_v37, 0.0 }
 0x62c   : > { %v3962_v15 = vsub.f32 %v3893_v31, %v1649_v12  ;;  %v1615_v16 = vpop.xlane.xlu1 %1614  ;;  %1699 = vadd.xlane.f32.xlu1 %v1698_v4  ;;  %v1695_v27 = vsel %vm1597_vm3, %v1679_v13, 0.0 }
 0x62d   : > { %v1652_v7 = vmul.f32 0.25, %v1615_v16  ;;  %1696 = vadd.xlane.f32.xlu0 %v1695_v27  ;;  %v1612_v26 = vpop.xlane.xlu0 %1611  ;;  %v1682_v24 = vmul.f32 %v3958_v25, %v3958_v25 }
 0x62e   : > { %v1651_v17 = vmul.f32 0.25, %v1612_v26  ;;  %v1681_v43 = vmul.f32 %v3962_v15, %v3962_v15 }
 0x62f   : > { %v3970_v63 = vsub.f32 %v3899_v23, %v1652_v7  ;;  %v1704_v31 = vsel %vm1597_vm3, %v1682_v24, 0.0 }
 0x630   : > { %v3974_v28 = vsub.f32 %v3901_v53, %v1651_v17  ;;  %v1621_v30 = vpop.xlane.xlu1 %1620  ;;  %1705 = vadd.xlane.f32.xlu1 %v1704_v31  ;;  %v1701_v36 = vsel %vm1597_vm3, %v1681_v43, 0.0 }
 0x631   : > { %v1654_v38 = vmul.f32 0.25, %v1621_v30  ;;  %1702 = vadd.xlane.f32.xlu0 %v1701_v36  ;;  %v1618_v39 = vpop.xlane.xlu0 %1617  ;;  %v1684_v33 = vmul.f32 %v3970_v63, %v3970_v63 }
 0x632   : > { %v1653_v41 = vmul.f32 0.25, %v1618_v39  ;;  %v1683_v23 = vmul.f32 %v3974_v28, %v3974_v28 }
 0x633   : > { %v3982_v14 = vsub.f32 %v3907_v42, %v1654_v38  ;;  %v1710_v53 = vsel %vm1597_vm3, %v1684_v33, 0.0 }
 0x634   : > { %v3986_v57 = vsub.f32 %v3909_v44, %v1653_v41  ;;  %v1627_v10 = vpop.xlane.xlu1 %1626  ;;  %1711 = vadd.xlane.f32.xlu1 %v1710_v53  ;;  %v1707_v45 = vsel %vm1597_vm3, %v1683_v23, 0.0 }
 0x635   : > { %v1656_v47 = vmul.f32 0.25, %v1627_v10  ;;  %1708 = vadd.xlane.f32.xlu0 %v1707_v45  ;;  %v1624_v62 = vpop.xlane.xlu0 %1623  ;;  %v1686_v9 = vmul.f32 %v3982_v14, %v3982_v14 }
 0x636   : > { %v1655_v50 = vmul.f32 0.25, %v1624_v62  ;;  %v1685_v42 = vmul.f32 %v3986_v57, %v3986_v57 }
 0x637   : > { %v3994_v51 = vsub.f32 %v3915_v46, %v1656_v47  ;;  %v1716_v44 = vsel %vm1597_vm3, %v1686_v9, 0.0 }
 0x638   : > { %v3998_v54 = vsub.f32 %v3917_v48, %v1655_v50  ;;  %v1633_v18 = vpop.xlane.xlu1 %1632  ;;  %1717 = vadd.xlane.f32.xlu1 %v1716_v44  ;;  %v1713_v8 = vsel %vm1597_vm3, %v1685_v42, 0.0  ;;  %v1809_v50 = vsub.s32 4, %v3643_v35 }
 0x639   : > { %v1658_v19 = vmul.f32 0.25, %v1633_v18  ;;  %1714 = vadd.xlane.f32.xlu0 %v1713_v8  ;;  %v1630_v49 = vpop.xlane.xlu0 %1629  ;;  %v1688_v60 = vmul.f32 %v3994_v51, %v3994_v51  ;;  %v1829_v18 = vsub.s32 5, %v3643_v35 }
 0x63a   : > { %v1657_v61 = vmul.f32 0.25, %v1630_v49  ;;  %v1687_v46 = vmul.f32 %v3998_v54, %v3998_v54 }
 0x63b   : > { %v4006_v58 = vsub.f32 %v3923_v29, %v1658_v19  ;;  %v1722_v48 = vsel %vm1597_vm3, %v1688_v60, 0.0 }
 0x63c   : > { %v4010_v1 = vsub.f32 %v3925_v52, %v1657_v61  ;;  %v1639_v21 = vpop.xlane.xlu1 %1638  ;;  %1723 = vadd.xlane.f32.xlu1 %v1722_v48  ;;  %v1719_v2 = vsel %vm1597_vm3, %v1687_v46, 0.0  ;;  %v4045_v61 = vld [vmem:[#allocation13] sm:$0xff] }
 0x63d   : > { %v1660_v0 = vmul.f32 0.25, %v1639_v21  ;;  %1720 = vadd.xlane.f32.xlu0 %v1719_v2  ;;  %v1636_v32 = vpop.xlane.xlu0 %1635  ;;  %v1690_v3 = vmul.f32 %v4006_v58, %v4006_v58  ;;  %v4048_v46 = vrot.slane %v4045_v61, %v1809_v50 }
 0x63e   : > { %v1659_v5 = vmul.f32 0.25, %v1636_v32  ;;  %v1689_v29 = vmul.f32 %v4010_v1, %v4010_v1  ;;  %v4051_v32 = vrot.slane %v4045_v61, %v1829_v18 }
 0x63f   : > { %v4018_v6 = vsub.f32 %v3931_v56, %v1660_v0  ;;  %v1728_v52 = vsel %vm1597_vm3, %v1690_v3, 0.0 }
 0x640   : > { %v4022_v11 = vsub.f32 %v3933_v59, %v1659_v5  ;;  %1729 = vadd.xlane.f32.xlu1 %v1728_v52  ;;  %v1645_v40 = vpop.xlane.xlu1 %1644  ;;  %v1725_v37 = vsel %vm1597_vm3, %v1689_v29, 0.0 }
 0x641   : > { %v1662_v12 = vmul.f32 0.25, %v1645_v40  ;;  %1726 = vadd.xlane.f32.xlu0 %v1725_v37  ;;  %v1642_v13 = vpop.xlane.xlu0 %1641  ;;  %v1692_v4 = vmul.f32 %v4018_v6, %v4018_v6 }
 0x642   : > { %v1661_v16 = vmul.f32 0.25, %v1642_v13  ;;  %v1691_v56 = vmul.f32 %v4022_v11, %v4022_v11 }
 0x643   : > { %v4030_v27 = vsub.f32 %v3939_v20, %v1662_v12  ;;  %v1734_v59 = vsel %vm1597_vm3, %v1692_v4, 0.0 }
 0x644   : > { %v4034_v7 = vsub.f32 %v3941_v55, %v1661_v16  ;;  %1735 = vadd.xlane.f32.xlu1 %v1734_v59  ;;  %v1731_v26 = vsel %vm1597_vm3, %v1691_v56, 0.0 }
 0x645   : > { %1732 = vadd.xlane.f32.xlu0 %v1731_v26  ;;  %v1694_v24 = vmul.f32 %v4030_v27, %v4030_v27 }
 0x646   : > { %v1693_v17 = vmul.f32 %v4034_v7, %v4034_v7 }
 0x647   : > { %v1740_v43 = vsel %vm1597_vm3, %v1694_v24, 0.0 }
 0x648   : > { %1741 = vadd.xlane.f32.xlu1 %v1740_v43  ;;  %v1737_v20 = vsel %vm1597_vm3, %v1693_v17, 0.0 }
 0x649   : > { %1738 = vadd.xlane.f32.xlu0 %v1737_v20 }
 0x6b9   : > { %v1700_v31 = vpop.xlane.xlu1 %1699 }
 0x6ba   : > { %v1744_v30 = vmul.f32 0.25, %v1700_v31  ;;  %v1697_v55 = vpop.xlane.xlu0 %1696 }
 0x6bb   : > { %v1743_v36 = vmul.f32 0.25, %v1697_v55 }
 0x6bc   : > { %v1760_v38 = vadd.f32 1e-05, %v1744_v30 }
 0x6bd   : > { %v1759_v39 = vadd.f32 1e-05, %v1743_v36  ;;  %v1706_v33 = vpop.xlane.xlu1 %1705 }
 0x6be   : > { %2858 = vrsqrt.f32 %v1760_v38  ;;  %v1746_v41 = vmul.f32 0.25, %v1706_v33  ;;  %v1703_v23 = vpop.xlane.xlu0 %1702 }
 0x6bf   : > { %2860 = vrsqrt.f32 %v1759_v39  ;;  %v1745_v53 = vmul.f32 0.25, %v1703_v23 }
 0x6c0   : > { %v1762_v10 = vadd.f32 1e-05, %v1746_v41 }
 0x6c1   : > { %v1761_v45 = vadd.f32 1e-05, %v1745_v53  ;;  %v1712_v47 = vpop.xlane.xlu1 %1711 }
 0x6c2   : > { %2862 = vrsqrt.f32 %v1762_v10  ;;  %v1748_v62 = vmul.f32 0.25, %v1712_v47  ;;  %v1709_v9 = vpop.xlane.xlu0 %1708 }
 0x6c3   : > { %2864 = vrsqrt.f32 %v1761_v45  ;;  %v1747_v42 = vmul.f32 0.25, %v1709_v9 }
 0x6c4   : > { %v1764_v44 = vadd.f32 1e-05, %v1748_v62 }
 0x6c5   : > { %v1763_v8 = vadd.f32 1e-05, %v1747_v42  ;;  %v1718_v19 = vpop.xlane.xlu1 %1717 }
 0x6c6   : > { %2866 = vrsqrt.f32 %v1764_v44  ;;  %v1750_v49 = vmul.f32 0.25, %v1718_v19  ;;  %v1715_v60 = vpop.xlane.xlu0 %1714 }
 0x6c7   : > { %2868 = vrsqrt.f32 %v1763_v8  ;;  %v1749_v48 = vmul.f32 0.25, %v1715_v60 }
 0x6c8   : > { %v2859_v21 = vpop.eup %2858  ;;  %v1766_v2 = vadd.f32 1e-05, %v1750_v49 }
 0x6c9   : > { %v2861_v0 = vpop.eup %2860  ;;  %v1792_v3 = vmul.f32 %v2859_v21, %v3948_v22  ;;  %v1765_v5 = vadd.f32 1e-05, %v1749_v48  ;;  %v1724_v29 = vpop.xlane.xlu1 %1723 }
 0x6ca   : > { %2870 = vrsqrt.f32 %v1766_v2  ;;  %v1752_v52 = vmul.f32 0.25, %v1724_v29  ;;  %v1721_v40 = vpop.xlane.xlu0 %1720  ;;  %v1791_v37 = vmul.f32 %v2861_v0, %v3951_v34 }
 0x6cb   : > { %v1812_v12 = vmul.f32 %v4048_v46, %v1792_v3  ;;  %2872 = vrsqrt.f32 %v1765_v5  ;;  %v1751_v13 = vmul.f32 0.25, %v1721_v40 }
 0x6cc   : > { %v2863_v4 = vpop.eup %2862  ;;  %v1768_v16 = vadd.f32 1e-05, %v1752_v52  ;;  %v1811_v56 = vmul.f32 %v4048_v46, %v1791_v37 }
 0x6cd   : > { %v2865_v59 = vpop.eup %2864  ;;  %v1832_v26 = vadd.f32 %v4051_v32, %v1812_v12  ;;  %v1767_v24 = vadd.f32 1e-05, %v1751_v13  ;;  %v1730_v22 = vpop.xlane.xlu1 %1729  ;;  %v1794_v17 = vmul.f32 %v2863_v4, %v3958_v25 }
 0x6ce   : > { %2874 = vrsqrt.f32 %v1768_v16  ;;  %v1754_v43 = vmul.f32 0.25, %v1730_v22  ;;  %v1727_v20 = vpop.xlane.xlu0 %1726  ;;  %v1831_v34 = vadd.f32 %v4051_v32, %v1811_v56  ;;  %v1793_v31 = vmul.f32 %v2865_v59, %v3962_v15 }
 0x6cf   : > { %2876 = vrsqrt.f32 %v1767_v24  ;;  %v1753_v30 = vmul.f32 0.25, %v1727_v20  ;;  %v1814_v55 = vmul.f32 %v4048_v46, %v1794_v17  ;;  %v1848_v23 = vmax.f32 %v1832_v26, 0.0 }
 0x6d0   : > { %v2867_v36 = vpop.eup %2866  ;;  %v1770_v38 = vadd.f32 1e-05, %v1754_v43  ;;  %v1847_v39 = vmax.f32 %v1831_v34, 0.0  ;;  %v1813_v33 = vmul.f32 %v4048_v46, %v1793_v31 }
 0x6d1   : > { %v2869_v41 = vpop.eup %2868  ;;  %v1769_v53 = vadd.f32 1e-05, %v1753_v30  ;;  %v1736_v25 = vpop.xlane.xlu1 %1735  ;;  %v1834_v10 = vadd.f32 %v4051_v32, %v1814_v55  ;;  %v1796_v45 = vmul.f32 %v2867_v36, %v3970_v63 }
 0x6d2   : > { %2878 = vrsqrt.f32 %v1770_v38  ;;  %v1756_v47 = vmul.f32 0.25, %v1736_v25  ;;  %2579 = vmatprep.mubr.msk.f32.mxu1 %vm1597_vm3, %v1847_v39  ;;  %v1733_v15 = vpop.xlane.xlu0 %1732  ;;  %v1833_v62 = vadd.f32 %v4051_v32, %v1813_v33  ;;  %v1795_v9 = vmul.f32 %v2869_v41, %v3974_v28 }
 0x6d3   : > { %2880 = vrsqrt.f32 %v1769_v53  ;;  %v1755_v50 = vmul.f32 0.25, %v1733_v15  ;;  %2580 = vmatmul.mubr.msk.f32.vlgmr.msra.gmra.mrb[26].mxu1 %vm1597_vm3, %v1848_v23  ;;  %v1816_v42 = vmul.f32 %v4048_v46, %v1796_v45  ;;  %v1850_v48 = vmax.f32 %v1834_v10, 0.0 }
 0x6d4   : > { %v2871_v44 = vpop.eup %2870  ;;  %v1772_v18 = vadd.f32 1e-05, %v1756_v47  ;;  %v1849_v8 = vmax.f32 %v1833_v62, 0.0  ;;  %v1815_v63 = vmul.f32 %v4048_v46, %v1795_v9 }
 0x6d5   : > { %v2873_v19 = vpop.eup %2872  ;;  %v1771_v49 = vadd.f32 1e-05, %v1755_v50  ;;  %v1742_v60 = vpop.xlane.xlu1 %1741  ;;  %v1836_v21 = vadd.f32 %v4051_v32, %v1816_v42  ;;  %v1798_v2 = vmul.f32 %v2871_v44, %v3982_v14 }
 0x6d6   : > { %2882 = vrsqrt.f32 %v1772_v18  ;;  %v1758_v28 = vmul.f32 0.25, %v1742_v60  ;;  %2582 = vmatprep.mubr.msk.f32.mxu1 %vm1597_vm3, %v1849_v8  ;;  %v1739_v0 = vpop.xlane.xlu0 %1738  ;;  %v1835_v3 = vadd.f32 %v4051_v32, %v1815_v63  ;;  %v1797_v5 = vmul.f32 %v2873_v19, %v3986_v57 }
 0x6d7   : > { %2884 = vrsqrt.f32 %v1771_v49  ;;  %v1757_v29 = vmul.f32 0.25, %v1739_v0  ;;  %2583 = vmatmul.mubr.msk.f32.gmra.mrb[28].mxu1 %vm1597_vm3, %v1850_v48  ;;  %v1818_v52 = vmul.f32 %v4048_v46, %v1798_v2  ;;  %v1852_v16 = vmax.f32 %v1836_v21, 0.0 }
 0x6d8   : > { %v2875_v40 = vpop.eup %2874  ;;  %v1774_v37 = vadd.f32 1e-05, %v1758_v28  ;;  %v1851_v12 = vmax.f32 %v1835_v3, 0.0  ;;  %v1817_v14 = vmul.f32 %v4048_v46, %v1797_v5  ;;  %v1866_v49 = vsub.s32 6, %v3643_v35 }
 0x6d9   : > { %v2877_v13 = vpop.eup %2876  ;;  %v1773_v4 = vadd.f32 1e-05, %v1757_v29  ;;  %v1838_v56 = vadd.f32 %v4051_v32, %v1818_v52  ;;  %v1800_v59 = vmul.f32 %v2875_v40, %v3994_v51 }
 0x6da   : > { %2886 = vrsqrt.f32 %v1774_v37  ;;  %2585 = vmatprep.mubr.msk.f32.mxu1 %vm1597_vm3, %v1851_v12  ;;  %v1837_v57 = vadd.f32 %v4051_v32, %v1817_v14  ;;  %v1799_v26 = vmul.f32 %v2877_v13, %v3998_v54 }
 0x6db   : > { %2888 = vrsqrt.f32 %v1773_v4  ;;  %2586 = vmatmul.mubr.msk.f32.gmra.mrb[30].mxu1 %vm1597_vm3, %v1852_v16  ;;  %v1820_v24 = vmul.f32 %v4048_v46, %v1800_v59  ;;  %v1854_v34 = vmax.f32 %v1838_v56, 0.0 }
 0x6dc   : > { %v2879_v22 = vpop.eup %2878  ;;  %v1853_v17 = vmax.f32 %v1837_v57, 0.0  ;;  %v1819_v43 = vmul.f32 %v4048_v46, %v1799_v26 }
 0x6dd   : > { %v2881_v20 = vpop.eup %2880  ;;  %v1840_v51 = vadd.f32 %v4051_v32, %v1820_v24  ;;  %v1802_v31 = vmul.f32 %v2879_v22, %v4006_v58 }
 0x6de   : > { %2588 = vmatprep.mubr.msk.f32.mxu1 %vm1597_vm3, %v1853_v17  ;;  %v1839_v30 = vadd.f32 %v4051_v32, %v1819_v43  ;;  %v1801_v54 = vmul.f32 %v2881_v20, %v4010_v1 }
 0x6df   : > { %2589 = vmatmul.mubr.msk.f32.gmra.mrb[32].mxu1 %vm1597_vm3, %v1854_v34  ;;  %v1822_v55 = vmul.f32 %v4048_v46, %v1802_v31  ;;  %v1856_v41 = vmax.f32 %v1840_v51, 0.0 }
 0x6e0   : > { %v2883_v36 = vpop.eup %2882  ;;  %v1855_v38 = vmax.f32 %v1839_v30, 0.0  ;;  %v1821_v39 = vmul.f32 %v4048_v46, %v1801_v54 }
 0x6e1   : > { %v2885_v33 = vpop.eup %2884  ;;  %v1842_v23 = vadd.f32 %v4051_v32, %v1822_v55  ;;  %v1804_v58 = vmul.f32 %v2883_v36, %v4018_v6 }
 0x6e2   : > { %2591 = vmatprep.mubr.msk.f32.mxu1 %vm1597_vm3, %v1855_v38  ;;  %v1841_v53 = vadd.f32 %v4051_v32, %v1821_v39  ;;  %v1803_v1 = vmul.f32 %v2885_v33, %v4022_v11 }
 0x6e3   : > { %2592 = vmatmul.mubr.msk.f32.gmra.mrb[34].mxu1 %vm1597_vm3, %v1856_v41  ;;  %v1824_v25 = vmul.f32 %v4048_v46, %v1804_v58  ;;  %v1858_v9 = vmax.f32 %v1842_v23, 0.0 }
 0x6e4   : > { %v2887_v10 = vpop.eup %2886  ;;  %v1857_v45 = vmax.f32 %v1841_v53, 0.0  ;;  %v1823_v47 = vmul.f32 %v4048_v46, %v1803_v1 }
 0x6e5   : > { %v2889_v15 = vpop.eup %2888  ;;  %v1806_v62 = vmul.f32 %v2887_v10, %v4030_v27  ;;  %v1844_v6 = vadd.f32 %v4051_v32, %v1824_v25 }
 0x6e6   : > { %v1805_v50 = vmul.f32 %v2889_v15, %v4034_v7  ;;  %2594 = vmatprep.mubr.msk.f32.mxu1 %vm1597_vm3, %v1857_v45  ;;  %v1843_v11 = vadd.f32 %v4051_v32, %v1823_v47 }
 0x6e7   : > { %2595 = vmatmul.mubr.msk.f32.gmra.mrb[36].mxu1 %vm1597_vm3, %v1858_v9  ;;  %v1826_v42 = vmul.f32 %v4048_v46, %v1806_v62  ;;  %v1860_v8 = vmax.f32 %v1844_v6, 0.0 }
 0x6e8   : > { %v1859_v44 = vmax.f32 %v1843_v11, 0.0  ;;  %v1825_v18 = vmul.f32 %v4048_v46, %v1805_v50  ;;  %v1867_v46 = vrot.slane %v4045_v61, %v1866_v49 }
 0x6e9   : > { %v1846_v27 = vadd.f32 %v4051_v32, %v1826_v42 }
 0x6ea   : > { %2597 = vmatprep.mubr.msk.f32.mxu1 %vm1597_vm3, %v1859_v44  ;;  %v1845_v63 = vadd.f32 %v4051_v32, %v1825_v18 }
 0x6eb   : > { %2598 = vmatmul.mubr.msk.f32.gmra.mrb[38].mxu1 %vm1597_vm3, %v1860_v8  ;;  %v1862_v19 = vmax.f32 %v1846_v27, 0.0 }
 0x6ec   : > { %v1861_v7 = vmax.f32 %v1845_v63, 0.0 }
 0x6ee   : > { %2600 = vmatprep.mubr.msk.f32.mxu1 %vm1597_vm3, %v1861_v7 }
 0x6ef   : > { %2601 = vmatmul.mubr.msk.f32.gmra.mrb[40].mxu1 %vm1597_vm3, %v1862_v19 }
 0x7a6   : > { %v2581_v60 = vpop.f32.mrb[26].mxu1 }
 0x7a7   : > { %v1992_v48 = vadd.f32 %v2581_v60, %v1867_v46  ;;  %v1986_v21 = vpop.f32.mrb[27].mxu1 }
 0x7a8   : > { %v1987_v2 = vadd.f32 %v1986_v21, %v1867_v46 }
 0x7a9   : > { %2066 = vst.msk [vmem:[%s4121_s8 + $0x8] sm:$0xff] %vm1132_vm2, %v1992_v48 }
 0x7aa   : > { %2065 = vst.msk [vmem:[%s4121_s8] sm:$0xff] %vm1132_vm2, %v1987_v2  ;;  %v2584_v35 = vpop.f32.mrb[28].mxu1 }
 0x7ab   : > { %v2002_v61 = vadd.f32 %v2584_v35, %v1867_v46  ;;  %v1996_v32 = vpop.f32.mrb[29].mxu1 }
 0x7ac   : > { %v1997_v28 = vadd.f32 %v1996_v32, %v1867_v46 }
 0x7ad   : > { %2068 = vst.msk [vmem:[%s4121_s8 + $0x18] sm:$0xff] %vm1132_vm2, %v2002_v61 }
 0x7ae   : > { %2067 = vst.msk [vmem:[%s4121_s8 + $0x10] sm:$0xff] %vm1132_vm2, %v1997_v28  ;;  %v2587_v0 = vpop.f32.mrb[30].mxu1 }
 0x7af   : > { %v2012_v3 = vadd.f32 %v2587_v0, %v1867_v46  ;;  %v2006_v5 = vpop.f32.mrb[31].mxu1 }
 0x7b0   : > { %v2007_v29 = vadd.f32 %v2006_v5, %v1867_v46 }
 0x7b1   : > { %2070 = vst.msk [vmem:[%s4121_s8 + $0x28] sm:$0xff] %vm1132_vm2, %v2012_v3 }
 0x7b2   : > { %2069 = vst.msk [vmem:[%s4121_s8 + $0x20] sm:$0xff] %vm1132_vm2, %v2007_v29  ;;  %v2590_v52 = vpop.f32.mrb[32].mxu1 }
 0x7b3   : > { %v2022_v40 = vadd.f32 %v2590_v52, %v1867_v46  ;;  %v2016_v37 = vpop.f32.mrb[33].mxu1 }
 0x7b4   : > { %v2017_v12 = vadd.f32 %v2016_v37, %v1867_v46 }
 0x7b5   : > { %2072 = vst.msk [vmem:[%s4121_s8 + $0x38] sm:$0xff] %vm1132_vm2, %v2022_v40 }
 0x7b6   : > { %2071 = vst.msk [vmem:[%s4121_s8 + $0x30] sm:$0xff] %vm1132_vm2, %v2017_v12  ;;  %v2593_v14 = vpop.f32.mrb[34].mxu1 }
 0x7b7   : > { %v2032_v13 = vadd.f32 %v2593_v14, %v1867_v46  ;;  %v2026_v4 = vpop.f32.mrb[35].mxu1 }
 0x7b8   : > { %v2027_v16 = vadd.f32 %v2026_v4, %v1867_v46 }
 0x7b9   : > { %2074 = vst.msk [vmem:[%s4121_s8 + $0x48] sm:$0xff] %vm1132_vm2, %v2032_v13 }
 0x7ba   : > { %2073 = vst.msk [vmem:[%s4121_s8 + $0x40] sm:$0xff] %vm1132_vm2, %v2027_v16  ;;  %v2596_v56 = vpop.f32.mrb[36].mxu1 }
 0x7bb   : > { %v2042_v59 = vadd.f32 %v2596_v56, %v1867_v46  ;;  %v2036_v57 = vpop.f32.mrb[37].mxu1 }
 0x7bc   : > { %v2037_v26 = vadd.f32 %v2036_v57, %v1867_v46 }
 0x7bd   : > { %2076 = vst.msk [vmem:[%s4121_s8 + $0x58] sm:$0xff] %vm1132_vm2, %v2042_v59 }
 0x7be   : > { %2075 = vst.msk [vmem:[%s4121_s8 + $0x50] sm:$0xff] %vm1132_vm2, %v2037_v26  ;;  %v2599_v24 = vpop.f32.mrb[38].mxu1 }
 0x7bf   : > { %v2052_v22 = vadd.f32 %v2599_v24, %v1867_v46  ;;  %v2046_v17 = vpop.f32.mrb[39].mxu1 }
 0x7c0   : > { %v2047_v43 = vadd.f32 %v2046_v17, %v1867_v46 }
 0x7c1   : > { %2078 = vst.msk [vmem:[%s4121_s8 + $0x68] sm:$0xff] %vm1132_vm2, %v2052_v22 }
 0x7c2   : > { %2077 = vst.msk [vmem:[%s4121_s8 + $0x60] sm:$0xff] %vm1132_vm2, %v2047_v43  ;;  %v2602_v20 = vpop.f32.mrb[40].mxu1 }
 0x7c3   : > { %v2062_v34 = vadd.f32 %v2602_v20, %v1867_v46  ;;  %v2056_v51 = vpop.f32.mrb[41].mxu1 }
 0x7c4   : > { %v2057_v31 = vadd.f32 %v2056_v51, %v1867_v46 }
 0x7c5   : > { %2080 = vst.msk [vmem:[%s4121_s8 + $0x78] sm:$0xff] %vm1132_vm2, %v2062_v34 }
 0x7c6   : > { %2079 = vst.msk [vmem:[%s4121_s8 + $0x70] sm:$0xff] %vm1132_vm2, %v2057_v31 }
 0x7c7   : > { %3102 = shalt.err (!%p3099_p8)
}
 0x7c8   : > { %s3103_s19 = scalar_lea.hbm %s4156_s13, 2048  ;;  %s3107_s8 = scalar_lea.hbm %s4213_s7, 4096 }
 0x7c9   : > { %p3104_p4 = scmp.ne.s32.totalorder %s4156_s13, %s3103_s19  ;;  %p3108_p3 = scmp.lt.u32.totalorder %s4156_s13, %s4213_s7 }
 0x7ca   : > { %p3109_p5 = scmp.lt.u32.totalorder %s3107_s8, %s3103_s19  ;;  %p3111_p6 = scmp.lt.u32.totalorder %s3103_s19, %s4156_s13 }
 0x7cb   : > { %p3105_p10 = pnand %p3104_p4, %p4235_p9 }
 0x7cc   : > { %p3110_p7 = por %p3109_p5, %p3108_p3 }
 0x7cd   : > { %p3106_p11 = pneg %p3105_p10 }
 0x7ce   : > { %p3112_p12 = por %p3111_p6, %p3110_p7 }
 0x7d0   : > { %p3113_p1 = pnand %p3112_p12, %p3106_p11 }
 0x7d2   : > { %3116 = shalt.err (!%p3113_p1)
}
 0x7d3   : > { %s3179_s9 = smov 128   ;;  %s3180_s20 = smov 8  }
 0x7d4   : > { %2677 = dma.vmem_to_hbm [thread:$0]  (%p4235_p9), %s4158_s28, 2048, %s4156_s13, %s2082_s30, %s3179_s9, %s3179_s9, %s3180_s20  }
 0x7d5 PF: > { %s2110_s10 = sand.u32 1, %s3155_s24   ;;  %p4236_p13 = scmp.ne.s32.totalorder %s4225_s18, 0 }
 0x7d6   : > { %p4237_p0 = scmp.ge.s32.totalorder %s3167_s27, 2  ;;  %s2111_s21 = scalar_lea.sflag [#allocation4], %s2110_s10 }
 0x7d8   : > { %p2703_p2 = pnand %p4237_p0, %p4236_p13 }
 0x7da   : > { %3150 = dma.done.wait (!%p2703_p2), %s2111_s21, 2048  }
 0x7db   : > { %3152 = vsyncadd (!%p2703_p2), %s2111_s21, 4294965248  ;;  %p23_p8 = scmp.ge.s32.totalorder %s3409_s11, 4   ;;  %s4238_s24 = smov %s3159_s25 }
 0x7dc   : > { %s4239_s25 = smov %s3163_s26  ;;  %s4240_s26 = smov %s3420_s12 }
 0x7dd   : > { %s4241_s27 = smov %s3409_s11  ;;  %25 = sbr.rel (!%p23_p8) target bundleno = 8 (0x8), region = 117 }
 0x7e4   :  { %2116 = vsyncpa [#allocation3], 1 }
 0x7e5   :  { %2118 = vsyncpa [#allocation3 + $0x1], 1 }
 0x7e6   :  { %2119 = vsyncpa [#allocation6], 1 }
 0x7e7   :  { %2120 = vsyncpa [#allocation9], 1 }
 0x7e8   :  { %2121 = vsyncpa [#allocation12], 1 }
 0x7e9   :  { %2122 = vsyncpa [#allocation4], 1 }
 0x7ea   :  { %2124 = vsyncpa [#allocation4 + $0x1], 1 }

</bundles_post_ra>
